<compile_context>
chip_gen: v6e
topology: v6e:2x2x1
jax: 0.10.0
libtpu: 0.0.40
codegen_flags: <defaults>
</compile_context>

<pallas_src>
import functools

import jax
import jax.numpy as jnp
from jax.experimental import pallas as pl
from jax.experimental.pallas import tpu as pltpu


# ------------------------- in-kernel helpers -------------------------

def _layer_norm(x, gamma, beta, eps=1e-5):
    mean = jnp.mean(x, axis=-1, keepdims=True)
    var = jnp.mean((x - mean) ** 2, axis=-1, keepdims=True)
    return (x - mean) * jax.lax.rsqrt(var + eps) * gamma + beta


def _mha(q, k, v, num_heads, causal):
    """Multi-head attention on 2-D (S, D) f32 tensors, head-batched.

    Heads are split once into an (H, S, hd) stack and the score / context
    matmuls + softmax run as single batched ops.  Matmul operands are bf16
    (f32 accumulation); softmax math stays f32.
    """
    S, D = q.shape
    Sk = k.shape[0]
    hd = D // num_heads
    scale = 1.0 / float(hd) ** 0.5

    qb = (q * scale).astype(jnp.bfloat16)
    kb = k.astype(jnp.bfloat16)
    vb = v.astype(jnp.bfloat16)
    qh = jnp.stack([qb[:, h * hd:(h + 1) * hd] for h in range(num_heads)], axis=0)
    kh = jnp.stack([kb[:, h * hd:(h + 1) * hd] for h in range(num_heads)], axis=0)
    vh = jnp.stack([vb[:, h * hd:(h + 1) * hd] for h in range(num_heads)], axis=0)

    # (H, S, Sk) scores, f32 accumulation on the MXU.
    s = jnp.einsum('hqd,hkd->hqk', qh, kh, preferred_element_type=jnp.float32)
    if causal:
        row = jax.lax.broadcasted_iota(jnp.int32, (S, Sk), 0)
        col = jax.lax.broadcasted_iota(jnp.int32, (S, Sk), 1)
        s = jnp.where((row >= col)[None], s, jnp.float32(-1e9))

    # f32 softmax; normalization reciprocal goes to the EUP slot.
    m = jnp.max(s, axis=-1, keepdims=True)
    p = jnp.exp(s - m)
    p = p * pl.reciprocal(jnp.sum(p, axis=-1, keepdims=True), approx=True)

    ctx = jnp.einsum('hqk,hkd->hqd', p.astype(jnp.bfloat16), vh,
                     preferred_element_type=jnp.float32)          # (H, S, hd)
    # merge heads back to packed (S, D) layout
    # TODO(synk): flash-style KV tiling (online softmax over a KV grid axis) is
    # needed before this scales to long sequences; full (H,S,Sk) scores are
    # materialized here.
    return jnp.concatenate([ctx[h] for h in range(num_heads)], axis=-1)


# Row indices into the packed per-layer vector slab (see _pack_layer_vectors).
_BQKV, _BO_S, _G1, _B1, _BQ, _BKV, _BO_C, _G2, _B2, _BF1, _BF2, _G3, _B3 = range(13)


# ------------------------- Pallas kernel -------------------------

def decoder_layer_kernel(x_ref, enc_ref,
                         wqkv_ref, wo_s_ref, wq_ref, wkv_ref, wo_c_ref,
                         w1_ref, w2_ref, vec_ref, out_ref, *, num_heads):
    x = x_ref[0].astype(jnp.float32)        # (S, D)
    D = x.shape[1]
    F = w1_ref.shape[1]

    def vrow(i, w):                          # (1, w) f32 row of the packed slab
        return vec_ref[i:i + 1, :w]

    def mm(a_f32, w_ref):                    # bf16 x bf16 matmul, f32 accumulation
        return jnp.dot(a_f32.astype(jnp.bfloat16), w_ref[...],
                       preferred_element_type=jnp.float32)

    # ---- masked (causal) self-attention ----
    qkv = mm(x, wqkv_ref) + vrow(_BQKV, 3 * D)
    q, k, v = qkv[:, :D], qkv[:, D:2 * D], qkv[:, 2 * D:]
    ctx = _mha(q, k, v, num_heads, causal=True)
    x = _layer_norm(x + mm(ctx, wo_s_ref) + vrow(_BO_S, D),
                    vrow(_G1, D), vrow(_B1, D))

    # ---- cross-attention over encoder hidden states ----
    qc = mm(x, wq_ref) + vrow(_BQ, D)
    kvc = mm(enc_ref[0].astype(jnp.float32), wkv_ref) + vrow(_BKV, 2 * D)
    ctx_c = _mha(qc, kvc[:, :D], kvc[:, D:], num_heads, causal=False)
    x = _layer_norm(x + mm(ctx_c, wo_c_ref) + vrow(_BO_C, D),
                    vrow(_G2, D), vrow(_B2, D))

    # ---- feed-forward ----
    h = jnp.maximum(mm(x, w1_ref) + vrow(_BF1, F), 0.0)
    x = _layer_norm(x + mm(h, w2_ref) + vrow(_BF2, D),
                    vrow(_G3, D), vrow(_B3, D))

    out_ref[0] = x.astype(out_ref.dtype)


# ------------------------- wrapper -------------------------

def decoder_layer_pallas(x, enc, lp, num_heads):
    B, S, D = x.shape
    F = lp['w1'].shape[1]
    assert D % num_heads == 0, "model_dim must be divisible by num_heads"

    weights = [lp['wqkv'], lp['wo_s'], lp['wq'], lp['wkv'], lp['wo_c'],
               lp['w1'], lp['w2']]
    vecs = lp['vecs']

    def const_spec(a):
        nd = a.ndim
        # Grid-invariant blocks: Pallas only DMAs them once per call.
        # TODO(synk): pipeline_mode=pl.Buffered(1) would also single-buffer
        # these (halves resident weight VMEM, matters most on v7x's 64 MiB).
        return pl.BlockSpec(a.shape, lambda b, _nd=nd: (0,) * _nd)

    in_specs = ([pl.BlockSpec((1, S, D), lambda b: (b, 0, 0)),
                 pl.BlockSpec((1, S, D), lambda b: (b, 0, 0))]
                + [const_spec(w) for w in weights]
                + [const_spec(vecs)])

    # --- advisory cost estimate + explicit VMEM budget ---
    flops = int(B * (2 * S * (8 * D * D + 2 * D * F) + 8 * S * S * D))
    transcendentals = int(B * (2 * num_heads * S * S + 3 * S))
    weight_bytes = int(sum(int(w.size) * 2 for w in weights) + int(vecs.size) * 4)
    bytes_accessed = int(3 * B * S * D * 4 + weight_bytes)

    inter_bytes = 4 * (10 * S * D + 2 * num_heads * S * S + 2 * S * F)
    io_bytes = 2 * 3 * (S * D * 4)           # double-buffered x / enc / out blocks
    vmem_limit = int(min(64 * 2 ** 20,
                         max(32 * 2 ** 20,
                             2 * (weight_bytes + inter_bytes + io_bytes))))

    kernel = functools.partial(decoder_layer_kernel, num_heads=num_heads)
    return pl.pallas_call(
        kernel,
        out_shape=jax.ShapeDtypeStruct((B, S, D), x.dtype),
        grid_spec=pltpu.PrefetchScalarGridSpec(
            num_scalar_prefetch=0,
            grid=(B,),
            in_specs=in_specs,
            out_specs=pl.BlockSpec((1, S, D), lambda b: (b, 0, 0)),
        ),
        compiler_params=pltpu.CompilerParams(
            dimension_semantics=("parallel",),
            vmem_limit_bytes=vmem_limit,
        ),
        cost_estimate=pl.CostEstimate(
            flops=flops, transcendentals=transcendentals,
            bytes_accessed=bytes_accessed),
    )(x, enc, *weights, vecs)


# ------------------------- parameter packing -------------------------

def _pack_layer_vectors(lp, D, F):
    """Pack the 13 small per-layer vectors into one (13, maxW) f32 slab."""
    maxw = max(3 * D, F)
    rows = [(lp['bqkv'], 3 * D), (lp['bo_s'], D), (lp['g1'], D), (lp['b1'], D),
            (lp['bq'], D), (lp['bkv'], 2 * D), (lp['bo_c'], D), (lp['g2'], D),
            (lp['b2'], D), (lp['bf1'], F), (lp['bf2'], D), (lp['g3'], D),
            (lp['b3'], D)]
    packed = jnp.zeros((len(rows), maxw), jnp.float32)
    for i, (vec, w) in enumerate(rows):
        packed = packed.at[i, :w].set(vec.reshape(-1).astype(jnp.float32))
    return packed


def prepare_layer_params(lp):
    """bf16 weight matrices (half the DMA/VMEM) + packed f32 vector slab."""
    D = lp['wqkv'].shape[0]
    F = lp['w1'].shape[1]
    prepared = {k: lp[k].astype(jnp.bfloat16)
                for k in ('wqkv', 'wo_s', 'wq', 'wkv', 'wo_c', 'w1', 'w2')}
    prepared['vecs'] = _pack_layer_vectors(lp, D, F)
    return prepared


# ------------------------- glue (embeddings + positions) -------------------------

def sinusoidal_positional_encoding(S, D):
    assert D % 2 == 0, "model_dim must be even for sinusoidal positional encoding"
    pos = jnp.arange(S, dtype=jnp.float32)[:, None]
    i = jnp.arange(0, D, 2, dtype=jnp.float32)
    div = jnp.exp(-jnp.log(10000.0) * i / D)
    pe = jnp.zeros((S, D), jnp.float32)
    pe = pe.at[:, 0::2].set(jnp.sin(pos * div))
    pe = pe.at[:, 1::2].set(jnp.cos(pos * div))
    return pe


def decoder_forward(input_tokens, encoder_hidden_states, params, num_heads):
    # embeddings + positional encoding (plain-JAX glue)
    x = params['embedding'][input_tokens]                       # (B, S, D)
    S, D = x.shape[1], x.shape[2]
    x = x + sinusoidal_positional_encoding(S, D)[None]
    # TODO(synk): dropout is identity (eval mode); training-mode dropout omitted.
    # TODO(synk): cross-call weight prefetch (or a fused layer-grid kernel) would
    # hide the per-layer weight DMA behind the previous layer's compute.
    for lp in params['layers']:
        x = decoder_layer_pallas(x, encoder_hidden_states,
                                 prepare_layer_params(lp), num_heads)
    return x


# ------------------------- deterministic parameter init -------------------------

def init_params(key, vocab_size, D, F, num_layers):
    keys = jax.random.split(key, 1 + num_layers)
    params = {
        'embedding': jax.random.normal(keys[0], (vocab_size, D), jnp.float32) * 0.02,
        'layers': [],
    }
    for l in range(num_layers):
        ks = jax.random.split(keys[1 + l], 6)
        lp = {
            'wqkv': jax.random.normal(ks[0], (D, 3 * D), jnp.float32) * 0.02,
            'bqkv': jnp.zeros((1, 3 * D), jnp.float32),
            'wo_s': jax.random.normal(ks[1], (D, D), jnp.float32) * 0.02,
            'bo_s': jnp.zeros((1, D), jnp.float32),
            'g1': jnp.ones((1, D), jnp.float32), 'b1': jnp.zeros((1, D), jnp.float32),
            'wq': jax.random.normal(ks[2], (D, D), jnp.float32) * 0.02,
            'bq': jnp.zeros((1, D), jnp.float32),
            'wkv': jax.random.normal(ks[3], (D, 2 * D), jnp.float32) * 0.02,
            'bkv': jnp.zeros((1, 2 * D), jnp.float32),
            'wo_c': jax.random.normal(ks[4], (D, D), jnp.float32) * 0.02,
            'bo_c': jnp.zeros((1, D), jnp.float32),
            'g2': jnp.ones((1, D), jnp.float32), 'b2': jnp.zeros((1, D), jnp.float32),
            'w1': jax.random.normal(ks[5], (D, F), jnp.float32) * 0.02,
            'bf1': jnp.zeros((1, F), jnp.float32),
            'w2': jax.random.normal(jax.random.fold_in(ks[5], 1), (F, D), jnp.float32) * 0.02,
            'bf2': jnp.zeros((1, D), jnp.float32),
            'g3': jnp.ones((1, D), jnp.float32), 'b3': jnp.zeros((1, D), jnp.float32),
        }
        params['layers'].append(lp)
    return params


if __name__ == "__main__":
    # small config consistent with the module's forward
    B, S = 2, 8
    VOCAB, D, HEADS, FFN, LAYERS = 100, 32, 4, 64, 2

    key = jax.random.PRNGKey(0)
    k_par, k_tok, k_enc = jax.random.split(key, 3)

    params = init_params(k_par, VOCAB, D, FFN, LAYERS)
    input_tokens = jax.random.randint(k_tok, (B, S), 0, VOCAB)
    encoder_hidden_states = jax.random.normal(k_enc, (B, S, D), jnp.float32)

    out = decoder_forward(input_tokens, encoder_hidden_states, params, HEADS)
    jax.block_until_ready(out)
    assert out.shape == (B, S, D)
    print("KERNEL_OK")
</pallas_src>

<mosaic_0001>
module attributes {stable_mosaic.version = 11 : i64} {
  func.func @decoder_layer_kernel(%arg0: i32, %arg1: memref<1x8x32xf32, #tpu.memory_space<vmem>>, %arg2: memref<1x8x32xf32, #tpu.memory_space<vmem>>, %arg3: memref<32x96xbf16, #tpu.memory_space<vmem>>, %arg4: memref<32x32xbf16, #tpu.memory_space<vmem>>, %arg5: memref<32x32xbf16, #tpu.memory_space<vmem>>, %arg6: memref<32x64xbf16, #tpu.memory_space<vmem>>, %arg7: memref<32x32xbf16, #tpu.memory_space<vmem>>, %arg8: memref<32x64xbf16, #tpu.memory_space<vmem>>, %arg9: memref<64x32xbf16, #tpu.memory_space<vmem>>, %arg10: memref<13x96xf32, #tpu.memory_space<vmem>>, %arg11: memref<1x8x32xf32, #tpu.memory_space<vmem>>) attributes {dimension_semantics = [#tpu.dimension_semantics<parallel>], iteration_bounds = array<i64: 2>, scalar_prefetch = 0 : i64, scratch_operands = 0 : i64, tpu.core_type = #tpu.core_type<tc>, window_params = [{transform_indices = @transform_0, window_bounds = array<i64: 1, 8, 32>}, {transform_indices = @transform_1, window_bounds = array<i64: 1, 8, 32>}, {pipeline_mode = #tpu.pipeline_mode<synchronous>, transform_indices = @transform_2, window_bounds = array<i64: 32, 96>}, {pipeline_mode = #tpu.pipeline_mode<synchronous>, transform_indices = @transform_3, window_bounds = array<i64: 32, 32>}, {pipeline_mode = #tpu.pipeline_mode<synchronous>, transform_indices = @transform_4, window_bounds = array<i64: 32, 32>}, {pipeline_mode = #tpu.pipeline_mode<synchronous>, transform_indices = @transform_5, window_bounds = array<i64: 32, 64>}, {pipeline_mode = #tpu.pipeline_mode<synchronous>, transform_indices = @transform_6, window_bounds = array<i64: 32, 32>}, {pipeline_mode = #tpu.pipeline_mode<synchronous>, transform_indices = @transform_7, window_bounds = array<i64: 32, 64>}, {pipeline_mode = #tpu.pipeline_mode<synchronous>, transform_indices = @transform_8, window_bounds = array<i64: 64, 32>}, {pipeline_mode = #tpu.pipeline_mode<synchronous>, transform_indices = @transform_9, window_bounds = array<i64: 13, 96>}, {transform_indices = @transform_10, window_bounds = array<i64: 1, 8, 32>}]} {
    %c0 = arith.constant 0 : index
    %c0_0 = arith.constant 0 : index
    %c0_1 = arith.constant 0 : index
    %0 = vector.load %arg1[%c0, %c0_0, %c0_1] : memref<1x8x32xf32, #tpu.memory_space<vmem>>, vector<1x8x32xf32>
    %1 = vector.shape_cast %0 : vector<1x8x32xf32> to vector<8x32xf32>
    %2 = arith.truncf %1 : vector<8x32xf32> to vector<8x32xbf16>
    %c0_2 = arith.constant 0 : index
    %c0_3 = arith.constant 0 : index
    %3 = vector.load %arg3[%c0_2, %c0_3] : memref<32x96xbf16, #tpu.memory_space<vmem>>, vector<32x96xbf16>
    %cst = arith.constant dense<0.000000e+00> : vector<8x96xf32>
    %4 = tpu.matmul %2, %3, %cst {dimension_numbers = #tpu.dot_dimension_numbers<[1], [0], [0], [1], [0, 0, 1, 1], [], []>} : vector<8x32xbf16>, vector<32x96xbf16>, vector<8x96xf32> -> vector<8x96xf32>
    %c0_4 = arith.constant 0 : index
    %c0_5 = arith.constant 0 : index
    %5 = vector.load %arg10[%c0_4, %c0_5] : memref<13x96xf32, #tpu.memory_space<vmem>>, vector<1x96xf32>
    %6 = vector.broadcast %5 : vector<1x96xf32> to vector<8x96xf32>
    %7 = arith.addf %4, %6 : vector<8x96xf32>
    %8 = vector.extract_strided_slice %7 {offsets = [0, 0], sizes = [8, 32], strides = [1, 1]} : vector<8x96xf32> to vector<8x32xf32>
    %9 = vector.extract_strided_slice %7 {offsets = [0, 32], sizes = [8, 32], strides = [1, 1]} : vector<8x96xf32> to vector<8x32xf32>
    %10 = vector.extract_strided_slice %7 {offsets = [0, 64], sizes = [8, 32], strides = [1, 1]} : vector<8x96xf32> to vector<8x32xf32>
    %cst_6 = arith.constant 0.353553385 : f32
    %11 = vector.broadcast %cst_6 : f32 to vector<8x32xf32>
    %12 = arith.mulf %8, %11 : vector<8x32xf32>
    %13 = arith.truncf %12 : vector<8x32xf32> to vector<8x32xbf16>
    %14 = arith.truncf %9 : vector<8x32xf32> to vector<8x32xbf16>
    %15 = arith.truncf %10 : vector<8x32xf32> to vector<8x32xbf16>
    %16 = vector.extract_strided_slice %13 {offsets = [0, 0], sizes = [8, 8], strides = [1, 1]} : vector<8x32xbf16> to vector<8x8xbf16>
    %17 = vector.extract_strided_slice %13 {offsets = [0, 8], sizes = [8, 8], strides = [1, 1]} : vector<8x32xbf16> to vector<8x8xbf16>
    %18 = vector.extract_strided_slice %13 {offsets = [0, 16], sizes = [8, 8], strides = [1, 1]} : vector<8x32xbf16> to vector<8x8xbf16>
    %19 = vector.extract_strided_slice %13 {offsets = [0, 24], sizes = [8, 8], strides = [1, 1]} : vector<8x32xbf16> to vector<8x8xbf16>
    %20 = vector.shape_cast %16 : vector<8x8xbf16> to vector<1x8x8xbf16>
    %21 = vector.shape_cast %17 : vector<8x8xbf16> to vector<1x8x8xbf16>
    %22 = vector.shape_cast %18 : vector<8x8xbf16> to vector<1x8x8xbf16>
    %23 = vector.shape_cast %19 : vector<8x8xbf16> to vector<1x8x8xbf16>
    %24 = tpu.concatenate %20, %21, %22, %23 in 0 : vector<1x8x8xbf16>, vector<1x8x8xbf16>, vector<1x8x8xbf16>, vector<1x8x8xbf16> -> vector<4x8x8xbf16>
    %25 = vector.extract_strided_slice %14 {offsets = [0, 0], sizes = [8, 8], strides = [1, 1]} : vector<8x32xbf16> to vector<8x8xbf16>
    %26 = vector.extract_strided_slice %14 {offsets = [0, 8], sizes = [8, 8], strides = [1, 1]} : vector<8x32xbf16> to vector<8x8xbf16>
    %27 = vector.extract_strided_slice %14 {offsets = [0, 16], sizes = [8, 8], strides = [1, 1]} : vector<8x32xbf16> to vector<8x8xbf16>
    %28 = vector.extract_strided_slice %14 {offsets = [0, 24], sizes = [8, 8], strides = [1, 1]} : vector<8x32xbf16> to vector<8x8xbf16>
    %29 = vector.shape_cast %25 : vector<8x8xbf16> to vector<1x8x8xbf16>
    %30 = vector.shape_cast %26 : vector<8x8xbf16> to vector<1x8x8xbf16>
    %31 = vector.shape_cast %27 : vector<8x8xbf16> to vector<1x8x8xbf16>
    %32 = vector.shape_cast %28 : vector<8x8xbf16> to vector<1x8x8xbf16>
    %33 = tpu.concatenate %29, %30, %31, %32 in 0 : vector<1x8x8xbf16>, vector<1x8x8xbf16>, vector<1x8x8xbf16>, vector<1x8x8xbf16> -> vector<4x8x8xbf16>
    %34 = vector.extract_strided_slice %15 {offsets = [0, 0], sizes = [8, 8], strides = [1, 1]} : vector<8x32xbf16> to vector<8x8xbf16>
    %35 = vector.extract_strided_slice %15 {offsets = [0, 8], sizes = [8, 8], strides = [1, 1]} : vector<8x32xbf16> to vector<8x8xbf16>
    %36 = vector.extract_strided_slice %15 {offsets = [0, 16], sizes = [8, 8], strides = [1, 1]} : vector<8x32xbf16> to vector<8x8xbf16>
    %37 = vector.extract_strided_slice %15 {offsets = [0, 24], sizes = [8, 8], strides = [1, 1]} : vector<8x32xbf16> to vector<8x8xbf16>
    %38 = vector.shape_cast %34 : vector<8x8xbf16> to vector<1x8x8xbf16>
    %39 = vector.shape_cast %35 : vector<8x8xbf16> to vector<1x8x8xbf16>
    %40 = vector.shape_cast %36 : vector<8x8xbf16> to vector<1x8x8xbf16>
    %41 = vector.shape_cast %37 : vector<8x8xbf16> to vector<1x8x8xbf16>
    %42 = tpu.concatenate %38, %39, %40, %41 in 0 : vector<1x8x8xbf16>, vector<1x8x8xbf16>, vector<1x8x8xbf16>, vector<1x8x8xbf16> -> vector<4x8x8xbf16>
    "tpu.trace_start"() <{level = 10 : i32, message = "hqd,hkd->hqk"}> : () -> ()
    %cst_7 = arith.constant dense<0.000000e+00> : vector<4x8x8xf32>
    %43 = tpu.matmul %24, %33, %cst_7 {dimension_numbers = #tpu.dot_dimension_numbers<[2], [2], [1], [1], [0, 0, 0, 1, 1, 1], [0], [0]>} : vector<4x8x8xbf16>, vector<4x8x8xbf16>, vector<4x8x8xf32> -> vector<4x8x8xf32>
    "tpu.trace_stop"() : () -> ()
    %44 = tpu.iota {dimensions = array<i32: 0>} : vector<8x8xi32>
    %45 = tpu.iota {dimensions = array<i32: 1>} : vector<8x8xi32>
    %46 = arith.cmpi sge, %44, %45 : vector<8x8xi32>
    %47 = vector.shape_cast %46 : vector<8x8xi1> to vector<1x8x8xi1>
    %cst_8 = arith.constant -1.000000e+09 : f32
    %48 = vector.shape_cast %47 : vector<1x8x8xi1> to vector<1x8x8xi1>
    %49 = vector.broadcast %48 : vector<1x8x8xi1> to vector<4x8x8xi1>
    %50 = vector.broadcast %cst_8 : f32 to vector<4x8x8xf32>
    %51 = arith.select %49, %43, %50 : vector<4x8x8xi1>, vector<4x8x8xf32>
    %cst_9 = arith.constant dense<0xFF800000> : vector<4x8xf32>
    %52 = vector.multi_reduction <maximumf>, %51, %cst_9 [2] : vector<4x8x8xf32> to vector<4x8xf32>
    %53 = vector.shape_cast %52 : vector<4x8xf32> to vector<4x8x1xf32>
    %54 = vector.broadcast %53 : vector<4x8x1xf32> to vector<4x8x8xf32>
    %55 = arith.subf %51, %54 : vector<4x8x8xf32>
    %56 = math.exp %55 : vector<4x8x8xf32>
    %cst_10 = arith.constant dense<0.000000e+00> : vector<4x8xf32>
    %57 = vector.multi_reduction <add>, %56, %cst_10 [2] : vector<4x8x8xf32> to vector<4x8xf32>
    %58 = vector.shape_cast %57 : vector<4x8xf32> to vector<4x8x1xf32>
    %59 = tpu.reciprocal %58 {approx = true} : vector<4x8x1xf32> -> vector<4x8x1xf32>
    %60 = vector.broadcast %59 : vector<4x8x1xf32> to vector<4x8x8xf32>
    %61 = arith.mulf %56, %60 : vector<4x8x8xf32>
    %62 = arith.truncf %61 : vector<4x8x8xf32> to vector<4x8x8xbf16>
    "tpu.trace_start"() <{level = 10 : i32, message = "hqk,hkd->hqd"}> : () -> ()
    %cst_11 = arith.constant dense<0.000000e+00> : vector<4x8x8xf32>
    %63 = tpu.matmul %62, %42, %cst_11 {dimension_numbers = #tpu.dot_dimension_numbers<[2], [1], [1], [2], [0, 0, 0, 1, 1, 2], [0], [0]>} : vector<4x8x8xbf16>, vector<4x8x8xbf16>, vector<4x8x8xf32> -> vector<4x8x8xf32>
    "tpu.trace_stop"() : () -> ()
    %64 = vector.extract_strided_slice %63 {offsets = [0, 0, 0], sizes = [1, 8, 8], strides = [1, 1, 1]} : vector<4x8x8xf32> to vector<1x8x8xf32>
    %65 = vector.shape_cast %64 : vector<1x8x8xf32> to vector<8x8xf32>
    %66 = vector.extract_strided_slice %63 {offsets = [1, 0, 0], sizes = [1, 8, 8], strides = [1, 1, 1]} : vector<4x8x8xf32> to vector<1x8x8xf32>
    %67 = vector.shape_cast %66 : vector<1x8x8xf32> to vector<8x8xf32>
    %68 = vector.extract_strided_slice %63 {offsets = [2, 0, 0], sizes = [1, 8, 8], strides = [1, 1, 1]} : vector<4x8x8xf32> to vector<1x8x8xf32>
    %69 = vector.shape_cast %68 : vector<1x8x8xf32> to vector<8x8xf32>
    %70 = vector.extract_strided_slice %63 {offsets = [3, 0, 0], sizes = [1, 8, 8], strides = [1, 1, 1]} : vector<4x8x8xf32> to vector<1x8x8xf32>
    %71 = vector.shape_cast %70 : vector<1x8x8xf32> to vector<8x8xf32>
    %72 = tpu.concatenate %65, %67, %69, %71 in 1 : vector<8x8xf32>, vector<8x8xf32>, vector<8x8xf32>, vector<8x8xf32> -> vector<8x32xf32>
    %73 = arith.truncf %72 : vector<8x32xf32> to vector<8x32xbf16>
    %c0_12 = arith.constant 0 : index
    %c0_13 = arith.constant 0 : index
    %74 = vector.load %arg4[%c0_12, %c0_13] : memref<32x32xbf16, #tpu.memory_space<vmem>>, vector<32x32xbf16>
    %cst_14 = arith.constant dense<0.000000e+00> : vector<8x32xf32>
    %75 = tpu.matmul %73, %74, %cst_14 {dimension_numbers = #tpu.dot_dimension_numbers<[1], [0], [0], [1], [0, 0, 1, 1], [], []>} : vector<8x32xbf16>, vector<32x32xbf16>, vector<8x32xf32> -> vector<8x32xf32>
    %76 = arith.addf %1, %75 : vector<8x32xf32>
    %c1 = arith.constant 1 : index
    %c0_15 = arith.constant 0 : index
    %77 = vector.load %arg10[%c1, %c0_15] : memref<13x96xf32, #tpu.memory_space<vmem>>, vector<1x32xf32>
    %78 = vector.broadcast %77 : vector<1x32xf32> to vector<8x32xf32>
    %79 = arith.addf %76, %78 : vector<8x32xf32>
    %c2 = arith.constant 2 : index
    %c0_16 = arith.constant 0 : index
    %80 = vector.load %arg10[%c2, %c0_16] : memref<13x96xf32, #tpu.memory_space<vmem>>, vector<1x32xf32>
    %c3 = arith.constant 3 : index
    %c0_17 = arith.constant 0 : index
    %81 = vector.load %arg10[%c3, %c0_17] : memref<13x96xf32, #tpu.memory_space<vmem>>, vector<1x32xf32>
    %cst_18 = arith.constant dense<0.000000e+00> : vector<8xf32>
    %82 = vector.multi_reduction <add>, %79, %cst_18 [1] : vector<8x32xf32> to vector<8xf32>
    %83 = vector.shape_cast %82 : vector<8xf32> to vector<8x1xf32>
    %cst_19 = arith.constant 3.200000e+01 : f32
    %84 = vector.broadcast %cst_19 : f32 to vector<8x1xf32>
    %85 = arith.divf %83, %84 : vector<8x1xf32>
    %86 = vector.broadcast %85 : vector<8x1xf32> to vector<8x32xf32>
    %87 = arith.subf %79, %86 : vector<8x32xf32>
    %88 = arith.mulf %87, %87 : vector<8x32xf32>
    %cst_20 = arith.constant dense<0.000000e+00> : vector<8xf32>
    %89 = vector.multi_reduction <add>, %88, %cst_20 [1] : vector<8x32xf32> to vector<8xf32>
    %90 = vector.shape_cast %89 : vector<8xf32> to vector<8x1xf32>
    %cst_21 = arith.constant 3.200000e+01 : f32
    %91 = vector.broadcast %cst_21 : f32 to vector<8x1xf32>
    %92 = arith.divf %90, %91 : vector<8x1xf32>
    %93 = vector.broadcast %85 : vector<8x1xf32> to vector<8x32xf32>
    %94 = arith.subf %79, %93 : vector<8x32xf32>
    %cst_22 = arith.constant 9.99999974E-6 : f32
    %95 = vector.broadcast %cst_22 : f32 to vector<8x1xf32>
    %96 = arith.addf %92, %95 : vector<8x1xf32>
    %97 = math.rsqrt %96 : vector<8x1xf32>
    %98 = vector.broadcast %97 : vector<8x1xf32> to vector<8x32xf32>
    %99 = arith.mulf %94, %98 : vector<8x32xf32>
    %100 = vector.broadcast %80 : vector<1x32xf32> to vector<8x32xf32>
    %101 = arith.mulf %99, %100 : vector<8x32xf32>
    %102 = vector.broadcast %81 : vector<1x32xf32> to vector<8x32xf32>
    %103 = arith.addf %101, %102 : vector<8x32xf32>
    %104 = arith.truncf %103 : vector<8x32xf32> to vector<8x32xbf16>
    %c0_23 = arith.constant 0 : index
    %c0_24 = arith.constant 0 : index
    %105 = vector.load %arg5[%c0_23, %c0_24] : memref<32x32xbf16, #tpu.memory_space<vmem>>, vector<32x32xbf16>
    %cst_25 = arith.constant dense<0.000000e+00> : vector<8x32xf32>
    %106 = tpu.matmul %104, %105, %cst_25 {dimension_numbers = #tpu.dot_dimension_numbers<[1], [0], [0], [1], [0, 0, 1, 1], [], []>} : vector<8x32xbf16>, vector<32x32xbf16>, vector<8x32xf32> -> vector<8x32xf32>
    %c4 = arith.constant 4 : index
    %c0_26 = arith.constant 0 : index
    %107 = vector.load %arg10[%c4, %c0_26] : memref<13x96xf32, #tpu.memory_space<vmem>>, vector<1x32xf32>
    %108 = vector.broadcast %107 : vector<1x32xf32> to vector<8x32xf32>
    %109 = arith.addf %106, %108 : vector<8x32xf32>
    %c0_27 = arith.constant 0 : index
    %c0_28 = arith.constant 0 : index
    %c0_29 = arith.constant 0 : index
    %110 = vector.load %arg2[%c0_27, %c0_28, %c0_29] : memref<1x8x32xf32, #tpu.memory_space<vmem>>, vector<1x8x32xf32>
    %111 = vector.shape_cast %110 : vector<1x8x32xf32> to vector<8x32xf32>
    %112 = arith.truncf %111 : vector<8x32xf32> to vector<8x32xbf16>
    %c0_30 = arith.constant 0 : index
    %c0_31 = arith.constant 0 : index
    %113 = vector.load %arg6[%c0_30, %c0_31] : memref<32x64xbf16, #tpu.memory_space<vmem>>, vector<32x64xbf16>
    %cst_32 = arith.constant dense<0.000000e+00> : vector<8x64xf32>
    %114 = tpu.matmul %112, %113, %cst_32 {dimension_numbers = #tpu.dot_dimension_numbers<[1], [0], [0], [1], [0, 0, 1, 1], [], []>} : vector<8x32xbf16>, vector<32x64xbf16>, vector<8x64xf32> -> vector<8x64xf32>
    %c5 = arith.constant 5 : index
    %c0_33 = arith.constant 0 : index
    %115 = vector.load %arg10[%c5, %c0_33] : memref<13x96xf32, #tpu.memory_space<vmem>>, vector<1x64xf32>
    %116 = vector.broadcast %115 : vector<1x64xf32> to vector<8x64xf32>
    %117 = arith.addf %114, %116 : vector<8x64xf32>
    %118 = vector.extract_strided_slice %117 {offsets = [0, 0], sizes = [8, 32], strides = [1, 1]} : vector<8x64xf32> to vector<8x32xf32>
    %119 = vector.extract_strided_slice %117 {offsets = [0, 32], sizes = [8, 32], strides = [1, 1]} : vector<8x64xf32> to vector<8x32xf32>
    %cst_34 = arith.constant 0.353553385 : f32
    %120 = vector.broadcast %cst_34 : f32 to vector<8x32xf32>
    %121 = arith.mulf %109, %120 : vector<8x32xf32>
    %122 = arith.truncf %121 : vector<8x32xf32> to vector<8x32xbf16>
    %123 = arith.truncf %118 : vector<8x32xf32> to vector<8x32xbf16>
    %124 = arith.truncf %119 : vector<8x32xf32> to vector<8x32xbf16>
    %125 = vector.extract_strided_slice %122 {offsets = [0, 0], sizes = [8, 8], strides = [1, 1]} : vector<8x32xbf16> to vector<8x8xbf16>
    %126 = vector.extract_strided_slice %122 {offsets = [0, 8], sizes = [8, 8], strides = [1, 1]} : vector<8x32xbf16> to vector<8x8xbf16>
    %127 = vector.extract_strided_slice %122 {offsets = [0, 16], sizes = [8, 8], strides = [1, 1]} : vector<8x32xbf16> to vector<8x8xbf16>
    %128 = vector.extract_strided_slice %122 {offsets = [0, 24], sizes = [8, 8], strides = [1, 1]} : vector<8x32xbf16> to vector<8x8xbf16>
    %129 = vector.shape_cast %125 : vector<8x8xbf16> to vector<1x8x8xbf16>
    %130 = vector.shape_cast %126 : vector<8x8xbf16> to vector<1x8x8xbf16>
    %131 = vector.shape_cast %127 : vector<8x8xbf16> to vector<1x8x8xbf16>
    %132 = vector.shape_cast %128 : vector<8x8xbf16> to vector<1x8x8xbf16>
    %133 = tpu.concatenate %129, %130, %131, %132 in 0 : vector<1x8x8xbf16>, vector<1x8x8xbf16>, vector<1x8x8xbf16>, vector<1x8x8xbf16> -> vector<4x8x8xbf16>
    %134 = vector.extract_strided_slice %123 {offsets = [0, 0], sizes = [8, 8], strides = [1, 1]} : vector<8x32xbf16> to vector<8x8xbf16>
    %135 = vector.extract_strided_slice %123 {offsets = [0, 8], sizes = [8, 8], strides = [1, 1]} : vector<8x32xbf16> to vector<8x8xbf16>
    %136 = vector.extract_strided_slice %123 {offsets = [0, 16], sizes = [8, 8], strides = [1, 1]} : vector<8x32xbf16> to vector<8x8xbf16>
    %137 = vector.extract_strided_slice %123 {offsets = [0, 24], sizes = [8, 8], strides = [1, 1]} : vector<8x32xbf16> to vector<8x8xbf16>
    %138 = vector.shape_cast %134 : vector<8x8xbf16> to vector<1x8x8xbf16>
    %139 = vector.shape_cast %135 : vector<8x8xbf16> to vector<1x8x8xbf16>
    %140 = vector.shape_cast %136 : vector<8x8xbf16> to vector<1x8x8xbf16>
    %141 = vector.shape_cast %137 : vector<8x8xbf16> to vector<1x8x8xbf16>
    %142 = tpu.concatenate %138, %139, %140, %141 in 0 : vector<1x8x8xbf16>, vector<1x8x8xbf16>, vector<1x8x8xbf16>, vector<1x8x8xbf16> -> vector<4x8x8xbf16>
    %143 = vector.extract_strided_slice %124 {offsets = [0, 0], sizes = [8, 8], strides = [1, 1]} : vector<8x32xbf16> to vector<8x8xbf16>
    %144 = vector.extract_strided_slice %124 {offsets = [0, 8], sizes = [8, 8], strides = [1, 1]} : vector<8x32xbf16> to vector<8x8xbf16>
    %145 = vector.extract_strided_slice %124 {offsets = [0, 16], sizes = [8, 8], strides = [1, 1]} : vector<8x32xbf16> to vector<8x8xbf16>
    %146 = vector.extract_strided_slice %124 {offsets = [0, 24], sizes = [8, 8], strides = [1, 1]} : vector<8x32xbf16> to vector<8x8xbf16>
    %147 = vector.shape_cast %143 : vector<8x8xbf16> to vector<1x8x8xbf16>
    %148 = vector.shape_cast %144 : vector<8x8xbf16> to vector<1x8x8xbf16>
    %149 = vector.shape_cast %145 : vector<8x8xbf16> to vector<1x8x8xbf16>
    %150 = vector.shape_cast %146 : vector<8x8xbf16> to vector<1x8x8xbf16>
    %151 = tpu.concatenate %147, %148, %149, %150 in 0 : vector<1x8x8xbf16>, vector<1x8x8xbf16>, vector<1x8x8xbf16>, vector<1x8x8xbf16> -> vector<4x8x8xbf16>
    "tpu.trace_start"() <{level = 10 : i32, message = "hqd,hkd->hqk"}> : () -> ()
    %cst_35 = arith.constant dense<0.000000e+00> : vector<4x8x8xf32>
    %152 = tpu.matmul %133, %142, %cst_35 {dimension_numbers = #tpu.dot_dimension_numbers<[2], [2], [1], [1], [0, 0, 0, 1, 1, 1], [0], [0]>} : vector<4x8x8xbf16>, vector<4x8x8xbf16>, vector<4x8x8xf32> -> vector<4x8x8xf32>
    "tpu.trace_stop"() : () -> ()
    %cst_36 = arith.constant dense<0xFF800000> : vector<4x8xf32>
    %153 = vector.multi_reduction <maximumf>, %152, %cst_36 [2] : vector<4x8x8xf32> to vector<4x8xf32>
    %154 = vector.shape_cast %153 : vector<4x8xf32> to vector<4x8x1xf32>
    %155 = vector.broadcast %154 : vector<4x8x1xf32> to vector<4x8x8xf32>
    %156 = arith.subf %152, %155 : vector<4x8x8xf32>
    %157 = math.exp %156 : vector<4x8x8xf32>
    %cst_37 = arith.constant dense<0.000000e+00> : vector<4x8xf32>
    %158 = vector.multi_reduction <add>, %157, %cst_37 [2] : vector<4x8x8xf32> to vector<4x8xf32>
    %159 = vector.shape_cast %158 : vector<4x8xf32> to vector<4x8x1xf32>
    %160 = tpu.reciprocal %159 {approx = true} : vector<4x8x1xf32> -> vector<4x8x1xf32>
    %161 = vector.broadcast %160 : vector<4x8x1xf32> to vector<4x8x8xf32>
    %162 = arith.mulf %157, %161 : vector<4x8x8xf32>
    %163 = arith.truncf %162 : vector<4x8x8xf32> to vector<4x8x8xbf16>
    "tpu.trace_start"() <{level = 10 : i32, message = "hqk,hkd->hqd"}> : () -> ()
    %cst_38 = arith.constant dense<0.000000e+00> : vector<4x8x8xf32>
    %164 = tpu.matmul %163, %151, %cst_38 {dimension_numbers = #tpu.dot_dimension_numbers<[2], [1], [1], [2], [0, 0, 0, 1, 1, 2], [0], [0]>} : vector<4x8x8xbf16>, vector<4x8x8xbf16>, vector<4x8x8xf32> -> vector<4x8x8xf32>
    "tpu.trace_stop"() : () -> ()
    %165 = vector.extract_strided_slice %164 {offsets = [0, 0, 0], sizes = [1, 8, 8], strides = [1, 1, 1]} : vector<4x8x8xf32> to vector<1x8x8xf32>
    %166 = vector.shape_cast %165 : vector<1x8x8xf32> to vector<8x8xf32>
    %167 = vector.extract_strided_slice %164 {offsets = [1, 0, 0], sizes = [1, 8, 8], strides = [1, 1, 1]} : vector<4x8x8xf32> to vector<1x8x8xf32>
    %168 = vector.shape_cast %167 : vector<1x8x8xf32> to vector<8x8xf32>
    %169 = vector.extract_strided_slice %164 {offsets = [2, 0, 0], sizes = [1, 8, 8], strides = [1, 1, 1]} : vector<4x8x8xf32> to vector<1x8x8xf32>
    %170 = vector.shape_cast %169 : vector<1x8x8xf32> to vector<8x8xf32>
    %171 = vector.extract_strided_slice %164 {offsets = [3, 0, 0], sizes = [1, 8, 8], strides = [1, 1, 1]} : vector<4x8x8xf32> to vector<1x8x8xf32>
    %172 = vector.shape_cast %171 : vector<1x8x8xf32> to vector<8x8xf32>
    %173 = tpu.concatenate %166, %168, %170, %172 in 1 : vector<8x8xf32>, vector<8x8xf32>, vector<8x8xf32>, vector<8x8xf32> -> vector<8x32xf32>
    %174 = arith.truncf %173 : vector<8x32xf32> to vector<8x32xbf16>
    %c0_39 = arith.constant 0 : index
    %c0_40 = arith.constant 0 : index
    %175 = vector.load %arg7[%c0_39, %c0_40] : memref<32x32xbf16, #tpu.memory_space<vmem>>, vector<32x32xbf16>
    %cst_41 = arith.constant dense<0.000000e+00> : vector<8x32xf32>
    %176 = tpu.matmul %174, %175, %cst_41 {dimension_numbers = #tpu.dot_dimension_numbers<[1], [0], [0], [1], [0, 0, 1, 1], [], []>} : vector<8x32xbf16>, vector<32x32xbf16>, vector<8x32xf32> -> vector<8x32xf32>
    %177 = arith.addf %103, %176 : vector<8x32xf32>
    %c6 = arith.constant 6 : index
    %c0_42 = arith.constant 0 : index
    %178 = vector.load %arg10[%c6, %c0_42] : memref<13x96xf32, #tpu.memory_space<vmem>>, vector<1x32xf32>
    %179 = vector.broadcast %178 : vector<1x32xf32> to vector<8x32xf32>
    %180 = arith.addf %177, %179 : vector<8x32xf32>
    %c7 = arith.constant 7 : index
    %c0_43 = arith.constant 0 : index
    %181 = vector.load %arg10[%c7, %c0_43] : memref<13x96xf32, #tpu.memory_space<vmem>>, vector<1x32xf32>
    %c8 = arith.constant 8 : index
    %c0_44 = arith.constant 0 : index
    %182 = vector.load %arg10[%c8, %c0_44] : memref<13x96xf32, #tpu.memory_space<vmem>>, vector<1x32xf32>
    %cst_45 = arith.constant dense<0.000000e+00> : vector<8xf32>
    %183 = vector.multi_reduction <add>, %180, %cst_45 [1] : vector<8x32xf32> to vector<8xf32>
    %184 = vector.shape_cast %183 : vector<8xf32> to vector<8x1xf32>
    %cst_46 = arith.constant 3.200000e+01 : f32
    %185 = vector.broadcast %cst_46 : f32 to vector<8x1xf32>
    %186 = arith.divf %184, %185 : vector<8x1xf32>
    %187 = vector.broadcast %186 : vector<8x1xf32> to vector<8x32xf32>
    %188 = arith.subf %180, %187 : vector<8x32xf32>
    %189 = arith.mulf %188, %188 : vector<8x32xf32>
    %cst_47 = arith.constant dense<0.000000e+00> : vector<8xf32>
    %190 = vector.multi_reduction <add>, %189, %cst_47 [1] : vector<8x32xf32> to vector<8xf32>
    %191 = vector.shape_cast %190 : vector<8xf32> to vector<8x1xf32>
    %cst_48 = arith.constant 3.200000e+01 : f32
    %192 = vector.broadcast %cst_48 : f32 to vector<8x1xf32>
    %193 = arith.divf %191, %192 : vector<8x1xf32>
    %194 = vector.broadcast %186 : vector<8x1xf32> to vector<8x32xf32>
    %195 = arith.subf %180, %194 : vector<8x32xf32>
    %cst_49 = arith.constant 9.99999974E-6 : f32
    %196 = vector.broadcast %cst_49 : f32 to vector<8x1xf32>
    %197 = arith.addf %193, %196 : vector<8x1xf32>
    %198 = math.rsqrt %197 : vector<8x1xf32>
    %199 = vector.broadcast %198 : vector<8x1xf32> to vector<8x32xf32>
    %200 = arith.mulf %195, %199 : vector<8x32xf32>
    %201 = vector.broadcast %181 : vector<1x32xf32> to vector<8x32xf32>
    %202 = arith.mulf %200, %201 : vector<8x32xf32>
    %203 = vector.broadcast %182 : vector<1x32xf32> to vector<8x32xf32>
    %204 = arith.addf %202, %203 : vector<8x32xf32>
    %205 = arith.truncf %204 : vector<8x32xf32> to vector<8x32xbf16>
    %c0_50 = arith.constant 0 : index
    %c0_51 = arith.constant 0 : index
    %206 = vector.load %arg8[%c0_50, %c0_51] : memref<32x64xbf16, #tpu.memory_space<vmem>>, vector<32x64xbf16>
    %cst_52 = arith.constant dense<0.000000e+00> : vector<8x64xf32>
    %207 = tpu.matmul %205, %206, %cst_52 {dimension_numbers = #tpu.dot_dimension_numbers<[1], [0], [0], [1], [0, 0, 1, 1], [], []>} : vector<8x32xbf16>, vector<32x64xbf16>, vector<8x64xf32> -> vector<8x64xf32>
    %c9 = arith.constant 9 : index
    %c0_53 = arith.constant 0 : index
    %208 = vector.load %arg10[%c9, %c0_53] : memref<13x96xf32, #tpu.memory_space<vmem>>, vector<1x64xf32>
    %209 = vector.broadcast %208 : vector<1x64xf32> to vector<8x64xf32>
    %210 = arith.addf %207, %209 : vector<8x64xf32>
    %cst_54 = arith.constant 0.000000e+00 : f32
    %211 = vector.broadcast %cst_54 : f32 to vector<8x64xf32>
    %212 = arith.maximumf %210, %211 : vector<8x64xf32>
    %213 = arith.truncf %212 : vector<8x64xf32> to vector<8x64xbf16>
    %c0_55 = arith.constant 0 : index
    %c0_56 = arith.constant 0 : index
    %214 = vector.load %arg9[%c0_55, %c0_56] : memref<64x32xbf16, #tpu.memory_space<vmem>>, vector<64x32xbf16>
    %cst_57 = arith.constant dense<0.000000e+00> : vector<8x32xf32>
    %215 = tpu.matmul %213, %214, %cst_57 {dimension_numbers = #tpu.dot_dimension_numbers<[1], [0], [0], [1], [0, 0, 1, 1], [], []>} : vector<8x64xbf16>, vector<64x32xbf16>, vector<8x32xf32> -> vector<8x32xf32>
    %216 = arith.addf %204, %215 : vector<8x32xf32>
    %c10 = arith.constant 10 : index
    %c0_58 = arith.constant 0 : index
    %217 = vector.load %arg10[%c10, %c0_58] : memref<13x96xf32, #tpu.memory_space<vmem>>, vector<1x32xf32>
    %218 = vector.broadcast %217 : vector<1x32xf32> to vector<8x32xf32>
    %219 = arith.addf %216, %218 : vector<8x32xf32>
    %c11 = arith.constant 11 : index
    %c0_59 = arith.constant 0 : index
    %220 = vector.load %arg10[%c11, %c0_59] : memref<13x96xf32, #tpu.memory_space<vmem>>, vector<1x32xf32>
    %c12 = arith.constant 12 : index
    %c0_60 = arith.constant 0 : index
    %221 = vector.load %arg10[%c12, %c0_60] : memref<13x96xf32, #tpu.memory_space<vmem>>, vector<1x32xf32>
    %cst_61 = arith.constant dense<0.000000e+00> : vector<8xf32>
    %222 = vector.multi_reduction <add>, %219, %cst_61 [1] : vector<8x32xf32> to vector<8xf32>
    %223 = vector.shape_cast %222 : vector<8xf32> to vector<8x1xf32>
    %cst_62 = arith.constant 3.200000e+01 : f32
    %224 = vector.broadcast %cst_62 : f32 to vector<8x1xf32>
    %225 = arith.divf %223, %224 : vector<8x1xf32>
    %226 = vector.broadcast %225 : vector<8x1xf32> to vector<8x32xf32>
    %227 = arith.subf %219, %226 : vector<8x32xf32>
    %228 = arith.mulf %227, %227 : vector<8x32xf32>
    %cst_63 = arith.constant dense<0.000000e+00> : vector<8xf32>
    %229 = vector.multi_reduction <add>, %228, %cst_63 [1] : vector<8x32xf32> to vector<8xf32>
    %230 = vector.shape_cast %229 : vector<8xf32> to vector<8x1xf32>
    %cst_64 = arith.constant 3.200000e+01 : f32
    %231 = vector.broadcast %cst_64 : f32 to vector<8x1xf32>
    %232 = arith.divf %230, %231 : vector<8x1xf32>
    %233 = vector.broadcast %225 : vector<8x1xf32> to vector<8x32xf32>
    %234 = arith.subf %219, %233 : vector<8x32xf32>
    %cst_65 = arith.constant 9.99999974E-6 : f32
    %235 = vector.broadcast %cst_65 : f32 to vector<8x1xf32>
    %236 = arith.addf %232, %235 : vector<8x1xf32>
    %237 = math.rsqrt %236 : vector<8x1xf32>
    %238 = vector.broadcast %237 : vector<8x1xf32> to vector<8x32xf32>
    %239 = arith.mulf %234, %238 : vector<8x32xf32>
    %240 = vector.broadcast %220 : vector<1x32xf32> to vector<8x32xf32>
    %241 = arith.mulf %239, %240 : vector<8x32xf32>
    %242 = vector.broadcast %221 : vector<1x32xf32> to vector<8x32xf32>
    %243 = arith.addf %241, %242 : vector<8x32xf32>
    %c0_66 = arith.constant 0 : index
    %c0_67 = arith.constant 0 : index
    %c0_68 = arith.constant 0 : index
    %244 = vector.load %arg11[%c0_66, %c0_67, %c0_68] : memref<1x8x32xf32, #tpu.memory_space<vmem>>, vector<1x8x32xf32>
    %245 = vector.shape_cast %244 : vector<1x8x32xf32> to vector<8x32xf32>
    %246 = vector.shape_cast %243 : vector<8x32xf32> to vector<1x8x32xf32>
    tpu.vector_store %arg11[%c0_66, %c0_67, %c0_68], %246 {strides = array<i32>} : memref<1x8x32xf32, #tpu.memory_space<vmem>>, vector<1x8x32xf32>,
    return
  }
  func.func @transform_0(%arg0: i32) -> (i32, i32, i32) {
    %c0_i32 = arith.constant 0 : i32
    %c0_i32_0 = arith.constant 0 : i32
    %c0_i32_1 = arith.constant 0 : i32
    return %arg0, %c0_i32, %c0_i32_0 : i32, i32, i32
  }
  func.func @transform_1(%arg0: i32) -> (i32, i32, i32) {
    %c0_i32 = arith.constant 0 : i32
    %c0_i32_0 = arith.constant 0 : i32
    %c0_i32_1 = arith.constant 0 : i32
    return %arg0, %c0_i32, %c0_i32_0 : i32, i32, i32
  }
  func.func @transform_2(%arg0: i32) -> (i32, i32) {
    %c0_i32 = arith.constant 0 : i32
    %c0_i32_0 = arith.constant 0 : i32
    %c0_i32_1 = arith.constant 0 : i32
    return %c0_i32, %c0_i32_0 : i32, i32
  }
  func.func @transform_3(%arg0: i32) -> (i32, i32) {
    %c0_i32 = arith.constant 0 : i32
    %c0_i32_0 = arith.constant 0 : i32
    %c0_i32_1 = arith.constant 0 : i32
    return %c0_i32, %c0_i32_0 : i32, i32
  }
  func.func @transform_4(%arg0: i32) -> (i32, i32) {
    %c0_i32 = arith.constant 0 : i32
    %c0_i32_0 = arith.constant 0 : i32
    %c0_i32_1 = arith.constant 0 : i32
    return %c0_i32, %c0_i32_0 : i32, i32
  }
  func.func @transform_5(%arg0: i32) -> (i32, i32) {
    %c0_i32 = arith.constant 0 : i32
    %c0_i32_0 = arith.constant 0 : i32
    %c0_i32_1 = arith.constant 0 : i32
    return %c0_i32, %c0_i32_0 : i32, i32
  }
  func.func @transform_6(%arg0: i32) -> (i32, i32) {
    %c0_i32 = arith.constant 0 : i32
    %c0_i32_0 = arith.constant 0 : i32
    %c0_i32_1 = arith.constant 0 : i32
    return %c0_i32, %c0_i32_0 : i32, i32
  }
  func.func @transform_7(%arg0: i32) -> (i32, i32) {
    %c0_i32 = arith.constant 0 : i32
    %c0_i32_0 = arith.constant 0 : i32
    %c0_i32_1 = arith.constant 0 : i32
    return %c0_i32, %c0_i32_0 : i32, i32
  }
  func.func @transform_8(%arg0: i32) -> (i32, i32) {
    %c0_i32 = arith.constant 0 : i32
    %c0_i32_0 = arith.constant 0 : i32
    %c0_i32_1 = arith.constant 0 : i32
    return %c0_i32, %c0_i32_0 : i32, i32
  }
  func.func @transform_9(%arg0: i32) -> (i32, i32) {
    %c0_i32 = arith.constant 0 : i32
    %c0_i32_0 = arith.constant 0 : i32
    %c0_i32_1 = arith.constant 0 : i32
    return %c0_i32, %c0_i32_0 : i32, i32
  }
  func.func @transform_10(%arg0: i32) -> (i32, i32, i32) {
    %c0_i32 = arith.constant 0 : i32
    %c0_i32_0 = arith.constant 0 : i32
    %c0_i32_1 = arith.constant 0 : i32
    return %arg0, %c0_i32, %c0_i32_0 : i32, i32, i32
  }
}

</mosaic_0001>

<bundles_post_ra>
// kernel: tpu_custom_call.1
= control target key start
LH: loop header
LB: loop body
LE: loop exit
PB: predicated region body
PF: predicated region fallthrough
CT: control target
= control target key end

     0   :  { %s3252_s0 = inlined_call_operand.vmem [shape: f32[2,8,32], index: 0, kind: input, shape index: {}]   ;;  %s3253_s1 = inlined_call_operand.vmem [shape: f32[2,8,32], index: 1, kind: input, shape index: {}]   ;;  %s3254_s2 = inlined_call_operand.vmem [shape: bf16[32,96], index: 2, kind: input, shape index: {}]   ;;  %s3255_s3 = inlined_call_operand.hbm [shape: bf16[32,32], index: 3, kind: input, shape index: {}]   ;;  %s3256_s4 = inlined_call_operand.hbm [shape: bf16[32,32], index: 4, kind: input, shape index: {}]   ;;  %s3257_s5 = inlined_call_operand.hbm [shape: bf16[32,64], index: 5, kind: input, shape index: {}]   ;;  %s3258_s6 = inlined_call_operand.hbm [shape: bf16[32,32], index: 6, kind: input, shape index: {}]   ;;  %s3259_s7 = inlined_call_operand.hbm [shape: bf16[32,64], index: 7, kind: input, shape index: {}]   ;;  %s3260_s8 = inlined_call_operand.vmem [shape: bf16[64,32], index: 8, kind: input, shape index: {}]   ;;  %s3261_s9 = inlined_call_operand.vmem [shape: f32[13,96], index: 9, kind: input, shape index: {}]   ;;  %s3262_s10 = inlined_call_operand.hbm [shape: f32[2,8,32], index: 10, kind: output, shape index: {}]  }
   0x1   :  { %3265 = sst [smem:[#allocation18_spill]] %s3256_s4 }
   0x2   :  { %15 = vsyncpa [#allocation3], 0 }
   0x3   :  { %16 = vsyncpa [#allocation6], 0 }
   0x4   :  { %17 = vsyncpa [#allocation9], 0 }
   0x5   :  { %18 = vsyncpa [#allocation4], 0 }
   0x6   :  { %20 = vsyncpa [#allocation4 + $0x1], 0  ;;  %s2792_s13 = smov 0   ;;  %s2794_s14 = smov 0  }
   0x7   :  { %s2796_s15 = smov 0   ;;  %s2798_s16 = smov 0  }
   0x8 LB: > { %3266 = sst [smem:[#allocation16_spill]] %s2713_s15  ;;  %s2813_s17 = sadd.s32 4294967295, %s2717_s16   ;;  %s2717_s16 = sphi %s2798_s16, %s3284_s16   ;;  %s2713_s15 = sphi %s2796_s15, %s3281_s15   ;;  %s2709_s14 = sphi %s2794_s14, %s3283_s14   ;;  %s2705_s13 = sphi %s2792_s13, %s3282_s13  }
   0x9   : > { %s2075_s18 = sadd.s32 4294967294, %s2717_s16   ;;  %s2817_s19 = sadd.s32 1, %s2717_s16  }
   0xa   : > { %s253_s20 = sadd.s32 1, %s2713_s15  ;;  %s250_s21 = ssub.s32 %s2717_s16, %s2817_s19 }
   0xb   : > { %p263_p0 = scmp.ne.s32.totalorder %s2713_s15, %s2709_s14  ;;  %p251_p1 = scmp.eq.s32.totalorder %s250_s21, 0 }
   0xc   : > { %p264_p2 = scmp.eq.s32.totalorder %s2813_s17, 1  ;;  %p269_p3 = scmp.ne.s32.totalorder %s2709_s14, %s2705_s13 }
   0xd   : > { %p270_p4 = scmp.eq.s32.totalorder %s2075_s18, 1  ;;  %p2076_p7 = scmp.ge.s32.totalorder %s2717_s16, 1 }
   0xe   : > { %s2828_s22 = scalar_select %p251_p1, %s2713_s15, %s253_s20  }
   0xf   : > { %p2830_p5 = por %p264_p2, %p263_p0  ;;  %p2834_p6 = por %p270_p4, %p269_p3 }
  0x10   : > { %3267 = sst [smem:[#allocation17_spill]] %s2828_s22  ;;  %p277_p8 = scmp.lt.s32.totalorder %s2717_s16, 3 }
  0x11   : > { %p3264_p9 = scmp.eq.s32.totalorder %s2813_s17, 0  ;;  %s2719_s26 = smov [#allocation5]  }
  0x12   : > { %p2841_p10 = pnand %p2076_p7, %p277_p8  ;;  %s305_s27 = sshll.u32 %s2719_s26, 4  ;;  %s306_s27 = int_to_ptr.vmem [resolvable:$true] %s305_s27 }
  0x13   : > { %s2720_s29 = smov [#allocation8]   ;;  %s2721_s11 = smov [#allocation2]  }
  0x14   : > { %p2381_p11 = pneg %p2841_p10  ;;  %s331_s30 = sshll.u32 %s2720_s29, 4  ;;  %s332_s30 = int_to_ptr.vmem [resolvable:$true] %s331_s30 }
  0x15   : > { %s292_s12 = sshll.u32 %s2721_s11, 4  ;;  %s2526_s20 = scalar_lea.vmem %s306_s27, 256  ;;  %s293_s12 = int_to_ptr.vmem [resolvable:$true] %s292_s12 }
  0x16   : > { %p2849_p12 = pnand %p3264_p9, %p2381_p11  ;;  %p2527_p0 = scmp.ne.s32.totalorder %s306_s27, %s2526_s20 }
  0x17   : > { %p2534_p3 = scmp.lt.s32.totalorder %s306_s27, %s306_s27  ;;  %p2535_p4 = scmp.lt.s32.totalorder %s2526_s20, %s2526_s20 }
  0x18   : > { %p2855_p13 = pneg %p2849_p12 }
  0x19   : > { %p2536_p7 = por %p2535_p4, %p2534_p3 }
  0x1a   : > { %p2529_p1 = pnand %p2527_p0, %p2855_p13 }
  0x1c   : > { %p2530_p2 = pneg %p2529_p1 }
  0x1e   : > { %p2537_p8 = pnand %p2536_p7, %p2530_p2 }
  0x20   : > { %2540 = shalt.err (!%p2537_p8)
}
  0x21   : > { %s2722_s21 = smov 64   ;;  %s2723_s26 = smov 4  }
  0x22   : > { %s3273_s4 = sld [smem:[#allocation18_spill]]  ;;  %s2552_s22 = scalar_lea.vmem %s332_s30, 256 }
  0x23   : > { %p2553_p11 = scmp.ne.s32.totalorder %s332_s30, %s2552_s22  ;;  %p2560_p3 = scmp.lt.s32.totalorder %s332_s30, %s332_s30 }
  0x24   : > { %p2561_p2 = scmp.lt.s32.totalorder %s2552_s22, %s2552_s22 }
  0x25   : > { %p2555_p0 = pnand %p2553_p11, %p2855_p13 }
  0x26   : > { %p2562_p4 = por %p2561_p2, %p2560_p3 }
  0x27   : > { %p2556_p1 = pneg %p2555_p0 }
  0x28   : > { %2387 = dma.hbm_to_vmem [thread:$0]  (!%p2849_p12), %s3273_s4, 256, %s306_s27, [#allocation6], %s2722_s21, %s2722_s21, %s2723_s26  }
  0x29   : > { %p2563_p7 = pnand %p2562_p4, %p2556_p1 }
  0x2b   : > { %2566 = shalt.err (!%p2563_p7)
}
  0x2c   : > { %2393 = dma.hbm_to_vmem [thread:$0]  (!%p2849_p12), %s3258_s6, 256, %s332_s30, [#allocation9], %s2722_s21, %s2722_s21, %s2723_s26  }
  0x2d   : > { %s2578_s27 = scalar_lea.vmem %s293_s12, 256  ;;  %p2586_p9 = scmp.lt.s32.totalorder %s293_s12, %s293_s12 }
  0x2e   : > { %p2579_p8 = scmp.ne.s32.totalorder %s293_s12, %s2578_s27  ;;  %p2587_p3 = scmp.lt.s32.totalorder %s2578_s27, %s2578_s27 }
  0x30   : > { %p2581_p11 = pnand %p2579_p8, %p2855_p13  ;;  %p2588_p1 = por %p2587_p3, %p2586_p9 }
  0x32   : > { %p2582_p0 = pneg %p2581_p11 }
  0x34   : > { %p2589_p2 = pnand %p2588_p1, %p2582_p0 }
  0x36   : > { %2592 = shalt.err (!%p2589_p2)
}
  0x37   : > { %2384 = dma.hbm_to_vmem [thread:$0]  (!%p2849_p12), %s3255_s3, 256, %s293_s12, [#allocation3], %s2722_s21, %s2722_s21, %s2723_s26  }
  0x38   : > { %s2724_s30 = smov [#allocation7]   ;;  %s2725_s11 = smov [#allocation10]  }
  0x39   : > { %s318_s29 = sshll.u32 %s2724_s30, 4  ;;  %s344_s20 = sshll.u32 %s2725_s11, 4  ;;  %s319_s29 = int_to_ptr.vmem [resolvable:$true] %s318_s29  ;;  %s345_s20 = int_to_ptr.vmem [resolvable:$true] %s344_s20 }
  0x3a   : > { %s2604_s4 = scalar_lea.vmem %s319_s29, 256  ;;  %p2612_p8 = scmp.lt.s32.totalorder %s319_s29, %s319_s29 }
  0x3b   : > { %p2605_p4 = scmp.ne.s32.totalorder %s319_s29, %s2604_s4  ;;  %p2613_p11 = scmp.lt.s32.totalorder %s2604_s4, %s2604_s4 }
  0x3d   : > { %p2607_p9 = pnand %p2605_p4, %p2855_p13  ;;  %p2614_p0 = por %p2613_p11, %p2612_p8 }
  0x3f   : > { %p2608_p7 = pneg %p2607_p9 }
  0x41   : > { %p2615_p3 = pnand %p2614_p0, %p2608_p7 }
  0x43   : > { %2618 = shalt.err (!%p2615_p3)
}
  0x44   : > { %2390 = dma.hbm_to_vmem [thread:$0]  (!%p2849_p12), %s3257_s5, 256, %s319_s29, [#allocation6], %s2722_s21, %s2722_s21, %s2723_s26  }
  0x45   : > { %s2630_s22 = scalar_lea.vmem %s345_s20, 256  ;;  %p2638_p9 = scmp.lt.s32.totalorder %s345_s20, %s345_s20 }
  0x46   : > { %p2631_p1 = scmp.ne.s32.totalorder %s345_s20, %s2630_s22  ;;  %p2639_p8 = scmp.lt.s32.totalorder %s2630_s22, %s2630_s22 }
  0x48   : > { %p2633_p2 = pnand %p2631_p1, %p2855_p13  ;;  %p2640_p7 = por %p2639_p8, %p2638_p9 }
  0x4a   : > { %p2634_p4 = pneg %p2633_p2 }
  0x4c   : > { %p2641_p11 = pnand %p2640_p7, %p2634_p4 }
  0x4e   : > { %2644 = shalt.err (!%p2641_p11)
}
  0x4f   : > { %2396 = dma.hbm_to_vmem [thread:$0]  (!%p2849_p12), %s3259_s7, 256, %s345_s20, [#allocation9], %s2722_s21, %s2722_s21, %s2723_s26  }
  0x50   : > { %380 = sbr.rel (%p2841_p10) target bundleno = 4236 (0x108c), region = 60  ;;  %p3274_p13 = scmp.eq.s32.totalorder (!%p2841_p10), %s2813_s17, 0 }
  0x55   : > { %2688 = dma.done.wait (%p3274_p13), [#allocation3], 256   ;;  %p3275_p0 = pmov %p3274_p13 }
  0x57   : > { %2690 = vsyncadd (%p3275_p0), [#allocation3], 4294967040  ;;  %p3276_p3 = pmov %p3275_p0 }
  0x58   : > { %p3277_p1 = pmov %p3275_p0 }
  0x59   : > { %2692 = dma.done.wait (%p3276_p3), [#allocation6], 512  }
  0x5a   : > { %2694 = vsyncadd (%p3277_p1), [#allocation6], 4294966784  ;;  %p3278_p2 = pmov %p3275_p0 }
  0x5b   : > { %p3279_p12 = pmov %p3275_p0 }
  0x5c   : > { %2696 = dma.done.wait (%p3278_p2), [#allocation9], 512  }
  0x5d   : > { %2698 = vsyncadd (%p3279_p12), [#allocation9], 4294966784  ;;  %p437_p10 = scmp.lt.s32.totalorder %s2813_s17, 1  ;;  %v2726_v0 = vmov 0.0   ;;  %vm2727_vm0 = vmmov 0   ;;  %v2461_v1 = vld [vmem:[%s3254_s2 + $0x8] sm:$0xff]   ;;  %v723_v28 = vlaneseq }
  0x5e   : > { %2203 = vmatprep.subr.bf16.mxu1 %v2726_v0  ;;  %2207 = vmatprep.mubr.msk.bf16.mxu1 %vm2727_vm0, %v2726_v0  ;;  %v2462_v2 = vld [vmem:[%s3254_s2] sm:$0xff]   ;;  %vm469_vm1 = vcmask 261120   ;;  %s2728_s22 = smov 104   ;;  %s2729_s4 = smov 120   ;;  %vm532_vm2 = vcmask 64512   ;;  %vm787_vm4 = vcmask 1043456  }
  0x5f   : > { %s2928_s25 = scalar_select %p437_p10, %s2813_s17, 1  ;;  %2217 = vmatprep.subr.bf16.mxu0 %v2726_v0  ;;  %2219 = vmatprep.mubr.msk.bf16.mxu0 %vm2727_vm0, %v2726_v0  ;;  %v2092_v5 = vld [vmem:[%s3261_s9] ss:$0 sm:$0xff]  ;;  %v724_v29 = vshrl.u32 %v723_v28, 7  ;;  %v726_v30 = vand.u32 127, %v723_v28  ;;  %vm988_vm5 = vcmask 130048  }
  0x60   : > { %2204 = vmatpush3.bf16.msra.mxu1 %v2461_v1  ;;  %s2730_s15 = smov 96   ;;  %s2731_s18 = smov 112   ;;  %vm990_vm6 = vcmask 195584   ;;  %vm1863_vm7 = vcmask 523264  }
  0x61   : > { %s2090_s28 = sshll.u32 %s2928_s25, 3  ;;  %2205 = vmatprep.subr.bf16.mxu1 %v2726_v0  ;;  %vm727_vm3 = vcmp.ge.s32.totalorder %v724_v29, %v726_v30  ;;  %s2732_s21 = smov 64  }
  0x62   : > { %s440_s26 = scalar_lea.vmem %s3252_s0, %s2090_s28  ;;  %s2734_s30 = smov 16  }
  0x63   : > { %v2945_v3 = vld [vmem:[%s440_s26] sm:$0xff]  ;;  %s2733_s26 = smov 8   ;;  %s2735_s29 = smov 24  }
  0x64   : > { %v447_v4 = vpack.c.bf16 %v2945_v3, %v2945_v3  ;;  %2206 = vmatpush3.bf16.msra.mxu1 %v2462_v2  ;;  %s2145_s12 = sshll.u32 %s2813_s17, 7 }
  0x65   : > { %2211 = vmatprep.subr.bf16.mxu1 %v2726_v0 }
  0x67   : > { %2208 = vmatmul.mubr.msk.bf16.vlgmr.msra.gmra.mxu1 %vm469_vm1, %v447_v4 }
  0x68   : > { %2213 = vmatprep.mubr.msk.bf16.mxu1 %vm2727_vm0, %v2726_v0 }
 0x127   : > { %v507_v6 = vpop.f32.mrf.mxu1 }
 0x128   : > { %v508_v7 = vadd.f32 %v2092_v5, %v507_v6 }
 0x129   : > { %v2209_v8 = vpop.f32.mrf.mxu1 }
 0x12a   : > { %v2957_v9 = vpack.c.bf16 %v508_v7, %v508_v7  ;;  %v513_v12 = vmul.f32 0.35355338, %v508_v7 }
 0x12b   : > { %v510_v10 = vpop.f32.mrf.mxu1 }
 0x12c   : > { %528 = vrot.lane.b32.xlu1 %v2957_v9, %s2728_s22  ;;  %524 = vrot.lane.b32.xlu0 %v2957_v9, %s2729_s4  ;;  %v514_v15 = vpack.c.bf16 %v513_v12, %v513_v12 }
 0x12d   : > { %v2210_v11 = vpop.f32.mrf.mxu1 }
 0x130   : > { %530 = vrot.lane.b32.xlu1 %v2957_v9, %s2730_s15  ;;  %526 = vrot.lane.b32.xlu0 %v2957_v9, %s2731_s18 }
 0x19e   : > { %v2967_v13 = vpop.permute.xlu1 %528  ;;  %v2969_v14 = vpop.permute.xlu0 %524 }
 0x19f   : > { %579 = vrot.lane.b32.xlu0 %v2969_v14, %s2730_s15 }
 0x1a2   : > { %v531_v16 = vpop.permute.xlu1 %530  ;;  %v2973_v17 = vpop.permute.xlu0 %526 }
 0x1a3   : > { %v537_v18 = vsel %vm532_vm2, %v531_v16, 0  ;;  %627 = vrot.lane.b32.xlu1 %v2973_v17, %s2730_s15  ;;  %517 = vrot.lane.b32.xlu0 %v514_v15, %s2729_s4 }
 0x1a4   : > { %2212 = vmatpush3.bf16.xpose.msra.mxu1 %v537_v18 }
 0x1a5   : > { %2223 = vmatprep.subr.bf16.mxu1 %v2726_v0 }
 0x1a7   : > { %675 = vrot.lane.b32.xlu1 %v2967_v13, %s2730_s15  ;;  %519 = vrot.lane.b32.xlu0 %v514_v15, %s2731_s18 }
 0x1ab   : > { %521 = vrot.lane.b32.xlu1 %v514_v15, %s2728_s22  ;;  %2214 = vmatmul.mubr.msk.bf16.vlgmr.msra.gmra.mxu1 %vm532_vm2, %v514_v15 }
 0x1ac   : > { %2225 = vmatprep.mubr.msk.bf16.mxu1 %vm2727_vm0, %v2726_v0 }
 0x211   : > { %v580_v19 = vpop.permute.xlu0 %579 }
 0x212   : > { %v585_v20 = vsel %vm532_vm2, %v580_v19, 0 }
 0x213   : > { %2218 = vmatpush3.bf16.xpose.msra.mxu0 %v585_v20 }
 0x214   : > { %2229 = vmatprep.subr.bf16.mxu0 %v2726_v0 }
 0x215   : > { %v628_v21 = vpop.permute.xlu1 %627  ;;  %v518_v23 = vpop.permute.xlu0 %517 }
 0x216   : > { %v633_v22 = vsel %vm532_vm2, %v628_v21, 0 }
 0x217   : > { %2224 = vmatpush3.bf16.xpose.msra.mxu1 %v633_v22 }
 0x218   : > { %2235 = vmatprep.subr.bf16.mxu1 %v2726_v0 }
 0x219   : > { %v676_v24 = vpop.permute.xlu1 %675  ;;  %v520_v26 = vpop.permute.xlu0 %519 }
 0x21a   : > { %v681_v25 = vsel %vm532_vm2, %v676_v24, 0  ;;  %2220 = vmatmul.mubr.msk.bf16.vlgmr.msra.gmra.mxu0 %vm532_vm2, %v518_v23 }
 0x21b   : > { %2230 = vmatpush3.bf16.xpose.msra.mxu0 %v681_v25  ;;  %2231 = vmatprep.mubr.msk.bf16.mxu0 %vm2727_vm0, %v2726_v0 }
 0x21c   : > { %2241 = vmatprep.subr.bf16.mxu0 %v2726_v0 }
 0x21d   : > { %v522_v27 = vpop.permute.xlu1 %521 }
 0x21e   : > { %2226 = vmatmul.mubr.msk.bf16.vlgmr.msra.gmra.mxu1 %vm532_vm2, %v520_v26 }
 0x21f   : > { %2237 = vmatprep.mubr.msk.bf16.mxu1 %vm2727_vm0, %v2726_v0 }
 0x222   : > { %2232 = vmatmul.mubr.msk.bf16.vlgmr.msra.gmra.mxu0 %vm532_vm2, %v522_v27 }
 0x223   : > { %2243 = vmatprep.mubr.msk.bf16.mxu0 %vm2727_vm0, %v2726_v0 }
 0x26b   : > { %v573_v31 = vpop.f32.mrf.mxu1 }
 0x26c   : > { %v730_v32 = vsel %vm727_vm3, %v573_v31, -1e+09 }
 0x26d   : > { %v2215_v33 = vpop.f32.mrf.mxu1  ;;  %v734_v34 = vsel %vm532_vm2, %v730_v32, -inf }
 0x26e   : > { %735 = vmax.xlane.f32.xlu0 %v734_v34 }
 0x26f   : > { %v576_v35 = vpop.f32.mrf.mxu1 }
 0x271   : > { %v2216_v36 = vpop.f32.mrf.mxu1 }
 0x2da   : > { %v621_v37 = vpop.f32.mrf.mxu0 }
 0x2db   : > { %v731_v38 = vsel %vm727_vm3, %v621_v37, -1e+09 }
 0x2dc   : > { %v2221_v39 = vpop.f32.mrf.mxu0  ;;  %v737_v40 = vsel %vm532_vm2, %v731_v38, -inf }
 0x2dd   : > { %738 = vmax.xlane.f32.xlu1 %v737_v40 }
 0x2de   : > { %v624_v41 = vpop.f32.mrf.mxu0  ;;  %v669_v42 = vpop.f32.mrf.mxu1 }
 0x2df   : > { %v732_v43 = vsel %vm727_vm3, %v669_v42, -1e+09  ;;  %v2463_v41 = vld [vmem:[#allocation2 + $0x8] sm:$0xff]   ;;  %v2464_v42 = vld [vmem:[#allocation2] sm:$0xff]  }
 0x2e0   : > { %v2222_v44 = vpop.f32.mrf.mxu0  ;;  %v2227_v45 = vpop.f32.mrf.mxu1  ;;  %v740_v46 = vsel %vm532_vm2, %v732_v43, -inf }
 0x2e1   : > { %741 = vmax.xlane.f32.xlu0 %v740_v46 }
 0x2e2   : > { %v672_v47 = vpop.f32.mrf.mxu1  ;;  %v717_v48 = vpop.f32.mrf.mxu0 }
 0x2e3   : > { %v733_v49 = vsel %vm727_vm3, %v717_v48, -1e+09 }
 0x2e4   : > { %v2228_v50 = vpop.f32.mrf.mxu1  ;;  %v2233_v51 = vpop.f32.mrf.mxu0  ;;  %v743_v52 = vsel %vm532_vm2, %v733_v49, -inf }
 0x2e5   : > { %744 = vmax.xlane.f32.xlu0 %v743_v52 }
 0x2e6   : > { %v720_v53 = vpop.f32.mrf.mxu0 }
 0x2e8   : > { %v2234_v54 = vpop.f32.mrf.mxu0 }
 0x2ee   : > { %782 = vrot.lane.b32.xlu1 %v2957_v9, %s2732_s21 }
 0x2f7   : > { %v736_v55 = vpop.xlane.xlu0 %735 }
 0x2f8   : > { %v746_v56 = vsub.f32 %v730_v32, %v736_v55 }
 0x2fa   : > { %v750_v57 = vmul.f32 1.442695, %v746_v56 }
 0x2fc   : > { %2477 = vpow2.f32 %v750_v57 }
 0x309   : > { %v2478_v58 = vpop.eup %2477 }
 0x30a   : > { %v758_v59 = vsel %vm532_vm2, %v2478_v58, 0.0 }
 0x312   : > { %759 = vadd.xlane.f32.xlu1 %v758_v59 }
 0x366   : > { %v739_v60 = vpop.xlane.xlu1 %738 }
 0x367   : > { %v747_v61 = vsub.f32 %v731_v38, %v739_v60 }
 0x369   : > { %v752_v62 = vmul.f32 1.442695, %v747_v61 }
 0x36a   : > { %v783_v63 = vpop.permute.xlu1 %782  ;;  %v742_v1 = vpop.xlane.xlu0 %741 }
 0x36b   : > { %2479 = vpow2.f32 %v752_v62  ;;  %v789_v2 = vsel %vm787_vm4, %v783_v63, 0  ;;  %v748_v4 = vsub.f32 %v732_v43, %v742_v1  ;;  %v2107_v63 = vld [vmem:[%s3261_s9 + $0x1] ss:$0 sm:$0xff] }
 0x36c   : > { %2236 = vmatpush3.bf16.msra.mxu1 %v789_v2 }
 0x36d   : > { %v754_v5 = vmul.f32 1.442695, %v748_v4  ;;  %2247 = vmatprep.subr.bf16.mxu1 %v2726_v0 }
 0x36e   : > { %v745_v6 = vpop.xlane.xlu0 %744 }
 0x36f   : > { %2481 = vpow2.f32 %v754_v5  ;;  %v749_v7 = vsub.f32 %v733_v49, %v745_v6 }
 0x371   : > { %v756_v8 = vmul.f32 1.442695, %v749_v7 }
 0x373   : > { %2483 = vpow2.f32 %v756_v8 }
 0x378   : > { %v2480_v9 = vpop.eup %2479 }
 0x379   : > { %v761_v10 = vsel %vm532_vm2, %v2480_v9, 0.0 }
 0x37a   : > { %762 = vadd.xlane.f32.xlu0 %v761_v10 }
 0x37c   : > { %v2482_v11 = vpop.eup %2481 }
 0x37d   : > { %v764_v12 = vsel %vm532_vm2, %v2482_v11, 0.0 }
 0x37e   : > { %765 = vadd.xlane.f32.xlu1 %v764_v12 }
 0x380   : > { %v2484_v15 = vpop.eup %2483 }
 0x381   : > { %v767_v16 = vsel %vm532_vm2, %v2484_v15, 0.0 }
 0x382   : > { %768 = vadd.xlane.f32.xlu0 %v767_v16 }
 0x38f   : > { %879 = vrot.lane.b32.xlu1 %v2973_v17, %s2732_s21 }
 0x393   : > { %927 = vrot.lane.b32.xlu1 %v2967_v13, %s2732_s21 }
 0x398   : > { %831 = vrot.lane.b32.xlu0 %v2969_v14, %s2732_s21  ;;  %s444_s21 = scalar_lea.vmem %s3253_s1, %s2090_s28 }
 0x399   : > { %v1150_v16 = vld [vmem:[%s444_s21] sm:$0xff] }
 0x39b   : > { %v760_v18 = vpop.xlane.xlu1 %759 }
 0x39c   : > { %2485 = vrcp.f32 %v760_v18  ;;  %v1151_v18 = vpack.c.bf16 %v1150_v16, %v1150_v16 }
 0x3a9   : > { %v2486_v19 = vpop.eup %2485 }
 0x3aa   : > { %v774_v20 = vmul.f32 %v2486_v19, %v2478_v58  ;;  %v2467_v19 = vld [vmem:[#allocation5 + $0x8] sm:$0xff]  }
 0x3ac   : > { %v778_v21 = vpack.c.bf16 %v774_v20, %v774_v20  ;;  %v2468_v20 = vld [vmem:[#allocation5] sm:$0xff]  }
 0x3ae   : > { %2238 = vmatmul.mubr.msk.bf16.vlgmr.msra.gmra.mxu1 %vm532_vm2, %v778_v21 }
 0x3af   : > { %2249 = vmatprep.mubr.msk.bf16.mxu1 %vm2727_vm0, %v2726_v0 }
 0x403   : > { %v763_v22 = vpop.xlane.xlu0 %762 }
 0x404   : > { %2487 = vrcp.f32 %v763_v22 }
 0x407   : > { %v766_v23 = vpop.xlane.xlu1 %765 }
 0x408   : > { %2489 = vrcp.f32 %v766_v23 }
 0x40b   : > { %v880_v17 = vpop.permute.xlu1 %879  ;;  %v769_v24 = vpop.xlane.xlu0 %768 }
 0x40c   : > { %v885_v13 = vsel %vm787_vm4, %v880_v17, 0  ;;  %2491 = vrcp.f32 %v769_v24  ;;  %v2108_v24 = vld [vmem:[%s3261_s9 + $0x2] ss:$0 sm:$0xff] }
 0x40d   : > { %2248 = vmatpush3.bf16.msra.mxu1 %v885_v13 }
 0x40e   : > { %2259 = vmatprep.subr.bf16.mxu1 %v2726_v0 }
 0x40f   : > { %v832_v14 = vpop.permute.xlu0 %831  ;;  %v928_v28 = vpop.permute.xlu1 %927 }
 0x410   : > { %v837_v25 = vsel %vm787_vm4, %v832_v14, 0  ;;  %v933_v31 = vsel %vm787_vm4, %v928_v28, 0  ;;  %v2109_v14 = vld [vmem:[%s3261_s9 + $0x3] ss:$0 sm:$0xff]  ;;  %v2114_v28 = vld [vmem:[%s3261_s9 + $0x5] ss:$0 sm:$0xff] }
 0x411   : > { %v2488_v26 = vpop.eup %2487  ;;  %2242 = vmatpush3.bf16.msra.mxu0 %v837_v25 }
 0x412   : > { %2253 = vmatprep.subr.bf16.mxu0 %v2726_v0  ;;  %v775_v27 = vmul.f32 %v2488_v26, %v2480_v9 }
 0x414   : > { %v779_v29 = vpack.c.bf16 %v775_v27, %v775_v27 }
 0x415   : > { %v2490_v30 = vpop.eup %2489 }
 0x416   : > { %2244 = vmatmul.mubr.msk.bf16.vlgmr.msra.gmra.mxu0 %vm532_vm2, %v779_v29  ;;  %v776_v32 = vmul.f32 %v2490_v30, %v2482_v11 }
 0x417   : > { %2254 = vmatpush3.bf16.msra.mxu0 %v933_v31  ;;  %2255 = vmatprep.mubr.msk.bf16.mxu0 %vm2727_vm0, %v2726_v0 }
 0x418   : > { %v780_v33 = vpack.c.bf16 %v776_v32, %v776_v32  ;;  %2267 = vmatprep.subr.bf16.mxu0 %v2726_v0 }
 0x419   : > { %v2492_v34 = vpop.eup %2491 }
 0x41a   : > { %2250 = vmatmul.mubr.msk.bf16.vlgmr.msra.gmra.mxu1 %vm532_vm2, %v780_v33  ;;  %v777_v35 = vmul.f32 %v2492_v34, %v2484_v15  ;;  %v2465_v15 = vld [vmem:[#allocation7 + $0x8] sm:$0xff]  }
 0x41b   : > { %2263 = vmatprep.mubr.msk.bf16.mxu1 %vm2727_vm0, %v2726_v0  ;;  %2260 = vmatpush3.bf16.msra.mxu1 %v2463_v41 }
 0x41c   : > { %v781_v36 = vpack.c.bf16 %v777_v35, %v777_v35  ;;  %2261 = vmatprep.subr.bf16.mxu1 %v2726_v0 }
 0x41e   : > { %2256 = vmatmul.mubr.msk.bf16.vlgmr.msra.gmra.mxu0 %vm532_vm2, %v781_v36 }
 0x41f   : > { %2271 = vmatprep.mubr.msk.bf16.mxu0 %vm2727_vm0, %v2726_v0  ;;  %2262 = vmatpush3.bf16.msra.mxu1 %v2464_v42 }
 0x420   : > { %2275 = vmatprep.subr.bf16.mxu1 %v2726_v0  ;;  %2268 = vmatpush3.bf16.msra.mxu0 %v2467_v19 }
 0x421   : > { %2269 = vmatprep.subr.bf16.mxu0 %v2726_v0 }
 0x424   : > { %2270 = vmatpush3.bf16.msra.mxu0 %v2468_v20 }
 0x425   : > { %2283 = vmatprep.subr.bf16.mxu0 %v2726_v0 }
 0x46e   : > { %v825_v37 = vpop.f32.mrf.mxu1 }
 0x470   : > { %v2239_v38 = vpop.f32.mrf.mxu1 }
 0x471   : > { %v2110_v38 = vld [vmem:[%s3261_s9 + $0x4] ss:$0 sm:$0xff] }
 0x472   : > { %v828_v39 = vpop.f32.mrf.mxu1 }
 0x474   : > { %v2240_v40 = vpop.f32.mrf.mxu1 }
 0x4d6   : > { %v873_v43 = vpop.f32.mrf.mxu0 }
 0x4d7   : > { %976 = vrot.lane.b32.xlu0 %v873_v43, %s2733_s26 }
 0x4d8   : > { %v2245_v44 = vpop.f32.mrf.mxu0 }
 0x4da   : > { %v876_v45 = vpop.f32.mrf.mxu0  ;;  %v921_v46 = vpop.f32.mrf.mxu1 }
 0x4db   : > { %980 = vrot.lane.b32.xlu1 %v921_v46, %s2734_s30 }
 0x4dc   : > { %v2246_v47 = vpop.f32.mrf.mxu0  ;;  %v2251_v48 = vpop.f32.mrf.mxu1 }
 0x4de   : > { %v924_v49 = vpop.f32.mrf.mxu1  ;;  %v969_v50 = vpop.f32.mrf.mxu0 }
 0x4df   : > { %984 = vrot.lane.b32.xlu0 %v969_v50, %s2735_s29 }
 0x4e0   : > { %v2252_v51 = vpop.f32.mrf.mxu1  ;;  %v2257_v52 = vpop.f32.mrf.mxu0 }
 0x4e2   : > { %v972_v53 = vpop.f32.mrf.mxu0 }
 0x4e4   : > { %v2258_v54 = vpop.f32.mrf.mxu0 }
 0x549   : > { %v977_v55 = vpop.permute.xlu0 %976 }
 0x54a   : > { %v987_v57 = vsel %vm532_vm2, %v825_v37, %v977_v55 }
 0x54d   : > { %v981_v56 = vpop.permute.xlu1 %980 }
 0x54e   : > { %v989_v58 = vsel %vm988_vm5, %v987_v57, %v981_v56 }
 0x551   : > { %v985_v59 = vpop.permute.xlu0 %984 }
 0x552   : > { %v991_v60 = vsel %vm990_vm6, %v989_v58, %v985_v59 }
 0x553   : > { %v992_v61 = vpack.c.bf16 %v991_v60, %v991_v60 }
 0x555   : > { %2264 = vmatmul.mubr.msk.bf16.vlgmr.msra.gmra.mxu1 %vm469_vm1, %v992_v61 }
 0x556   : > { %2279 = vmatprep.mubr.msk.bf16.mxu1 %vm2727_vm0, %v2726_v0  ;;  %2276 = vmatpush3.bf16.msra.mxu1 %v2465_v15 }
 0x557   : > { %2277 = vmatprep.subr.bf16.mxu1 %v2726_v0 }
 0x615   : > { %v1046_v62 = vpop.f32.mrf.mxu1 }
 0x616   : > { %v1052_v1 = vadd.f32 %v1046_v62, %v2945_v3  ;;  %v2466_v3 = vld [vmem:[#allocation7] sm:$0xff]  }
 0x617   : > { %v2265_v2 = vpop.f32.mrf.mxu1  ;;  %2278 = vmatpush3.bf16.msra.mxu1 %v2466_v3 }
 0x618   : > { %v1058_v4 = vadd.f32 %v2107_v63, %v1052_v1  ;;  %2289 = vmatprep.subr.bf16.mxu1 %v2726_v0 }
 0x619   : > { %v1049_v5 = vpop.f32.mrf.mxu1 }
 0x61a   : > { %v1061_v6 = vsel %vm469_vm1, %v1058_v4, 0.0  ;;  %2280 = vmatmul.mubr.msk.bf16.vlgmr.msra.gmra.mxu1 %vm469_vm1, %v1151_v18 }
 0x61b   : > { %1062 = vadd.xlane.f32.xlu1 %v1061_v6  ;;  %v2266_v7 = vpop.f32.mrf.mxu1  ;;  %2291 = vmatprep.mubr.msk.bf16.mxu1 %vm2727_vm0, %v2726_v0 }
 0x6a4   : > { %v1063_v8 = vpop.xlane.xlu1 %1062 }
 0x6a5   : > { %v1065_v9 = vmul.f32 0.03125, %v1063_v8 }
 0x6a7   : > { %v1066_v10 = vsub.f32 %v1058_v4, %v1065_v9 }
 0x6a9   : > { %v1067_v11 = vmul.f32 %v1066_v10, %v1066_v10 }
 0x6ab   : > { %v1068_v12 = vsel %vm469_vm1, %v1067_v11, 0.0 }
 0x6ac   : > { %1069 = vadd.xlane.f32.xlu0 %v1068_v12 }
 0x6da   : > { %v1210_v29 = vpop.f32.mrf.mxu1 }
 0x6db   : > { %v1211_v30 = vadd.f32 %v2114_v28, %v1210_v29 }
 0x6dc   : > { %v2281_v31 = vpop.f32.mrf.mxu1 }
 0x6dd   : > { %v3087_v32 = vpack.c.bf16 %v1211_v30, %v1211_v30 }
 0x6de   : > { %v1213_v33 = vpop.f32.mrf.mxu1 }
 0x6df   : > { %1227 = vrot.lane.b32.xlu0 %v3087_v32, %s2729_s4  ;;  %1229 = vrot.lane.b32.xlu1 %v3087_v32, %s2731_s18  ;;  %v1237_v35 = vsel %vm532_vm2, %v3087_v32, 0 }
 0x6e0   : > { %v2282_v34 = vpop.f32.mrf.mxu1 }
 0x6e3   : > { %1231 = vrot.lane.b32.xlu0 %v3087_v32, %s2728_s22 }
 0x735   : > { %v1070_v21 = vpop.xlane.xlu0 %1069 }
 0x736   : > { %v1071_v22 = vmul.f32 0.03125, %v1070_v21 }
 0x738   : > { %v1072_v23 = vadd.f32 1e-05, %v1071_v22 }
 0x73a   : > { %2493 = vrsqrt.f32 %v1072_v23 }
 0x747   : > { %v2494_v17 = vpop.eup %2493 }
 0x748   : > { %v1074_v13 = vmul.f32 %v2494_v17, %v1066_v10 }
 0x74a   : > { %v1079_v25 = vmul.f32 %v2108_v24, %v1074_v13 }
 0x74c   : > { %v3077_v26 = vadd.f32 %v2109_v14, %v1079_v25 }
 0x74e   : > { %v1085_v27 = vpack.c.bf16 %v3077_v26, %v3077_v26 }
 0x750   : > { %2272 = vmatmul.mubr.msk.bf16.vlgmr.msra.gmra.mxu0 %vm469_vm1, %v1085_v27 }
 0x751   : > { %2285 = vmatprep.mubr.msk.bf16.mxu0 %vm2727_vm0, %v2726_v0  ;;  %2284 = vmatpush3.bf16.xpose.msra.mxu0 %v1237_v35  ;;  %v1228_v36 = vpop.permute.xlu0 %1227  ;;  %v3103_v43 = vpop.permute.xlu1 %1229 }
 0x752   : > { %2295 = vmatprep.subr.bf16.mxu0 %v2726_v0  ;;  %v1283_v37 = vsel %vm532_vm2, %v1228_v36, 0  ;;  %v1329_v47 = vsel %vm532_vm2, %v3103_v43, 0 }
 0x753   : > { %2290 = vmatpush3.bf16.xpose.msra.mxu1 %v1283_v37 }
 0x754   : > { %2301 = vmatprep.subr.bf16.mxu1 %v2726_v0 }
 0x755   : > { %v3114_v48 = vpop.permute.xlu0 %1231 }
 0x756   : > { %v1375_v50 = vsel %vm532_vm2, %v3114_v48, 0 }
 0x810   : > { %v1144_v39 = vpop.f32.mrf.mxu0 }
 0x811   : > { %v1145_v40 = vadd.f32 %v2110_v38, %v1144_v39 }
 0x812   : > { %v2273_v41 = vpop.f32.mrf.mxu0 }
 0x813   : > { %v1216_v42 = vmul.f32 0.35355338, %v1145_v40 }
 0x814   : > { %v1147_v44 = vpop.f32.mrf.mxu0 }
 0x815   : > { %v1217_v45 = vpack.c.bf16 %v1216_v42, %v1216_v42 }
 0x816   : > { %v2274_v46 = vpop.f32.mrf.mxu0 }
 0x817   : > { %1220 = vrot.lane.b32.xlu1 %v1217_v45, %s2729_s4  ;;  %1224 = vrot.lane.b32.xlu0 %v1217_v45, %s2728_s22  ;;  %s1952_s4 = scalar_lea.hbm %s3262_s10, %s2145_s12 }
 0x818   : > { %2286 = vmatmul.mubr.msk.bf16.vlgmr.msra.gmra.mxu0 %vm532_vm2, %v1217_v45 }
 0x819   : > { %2296 = vmatpush3.bf16.xpose.msra.mxu0 %v1329_v47  ;;  %2297 = vmatprep.mubr.msk.bf16.mxu0 %vm2727_vm0, %v2726_v0 }
 0x81a   : > { %2307 = vmatprep.subr.bf16.mxu0 %v2726_v0 }
 0x81b   : > { %1222 = vrot.lane.b32.xlu1 %v1217_v45, %s2731_s18 }
 0x889   : > { %v1221_v49 = vpop.permute.xlu1 %1220  ;;  %v1225_v52 = vpop.permute.xlu0 %1224 }
 0x88a   : > { %2292 = vmatmul.mubr.msk.bf16.vlgmr.msra.gmra.mxu1 %vm532_vm2, %v1221_v49 }
 0x88b   : > { %2302 = vmatpush3.bf16.xpose.msra.mxu1 %v1375_v50  ;;  %2303 = vmatprep.mubr.msk.bf16.mxu1 %vm2727_vm0, %v2726_v0 }
 0x88c   : > { %2313 = vmatprep.subr.bf16.mxu1 %v2726_v0 }
 0x88d   : > { %v1223_v51 = vpop.permute.xlu1 %1222 }
 0x88e   : > { %2298 = vmatmul.mubr.msk.bf16.vlgmr.msra.gmra.mxu0 %vm532_vm2, %v1223_v51 }
 0x88f   : > { %2309 = vmatprep.mubr.msk.bf16.mxu0 %vm2727_vm0, %v2726_v0 }
 0x892   : > { %2304 = vmatmul.mubr.msk.bf16.vlgmr.msra.gmra.mxu1 %vm532_vm2, %v1225_v52 }
 0x893   : > { %2315 = vmatprep.mubr.msk.bf16.mxu1 %vm2727_vm0, %v2726_v0 }
 0x8d8   : > { %v1273_v53 = vpop.f32.mrf.mxu0 }
 0x8d9   : > { %v1417_v54 = vsel %vm532_vm2, %v1273_v53, -inf }
 0x8da   : > { %1418 = vmax.xlane.f32.xlu1 %v1417_v54  ;;  %v2287_v55 = vpop.f32.mrf.mxu0 }
 0x8dc   : > { %v1276_v56 = vpop.f32.mrf.mxu0 }
 0x8de   : > { %v2288_v57 = vpop.f32.mrf.mxu0 }
 0x94a   : > { %v1319_v58 = vpop.f32.mrf.mxu1 }
 0x94b   : > { %v1420_v59 = vsel %vm532_vm2, %v1319_v58, -inf }
 0x94c   : > { %1421 = vmax.xlane.f32.xlu0 %v1420_v59  ;;  %v2293_v60 = vpop.f32.mrf.mxu1  ;;  %v2469_v59 = vld [vmem:[#allocation8 + $0x8] sm:$0xff]  }
 0x94d   : > { %v2470_v60 = vld [vmem:[#allocation8] sm:$0xff]  }
 0x94e   : > { %v1322_v61 = vpop.f32.mrf.mxu1  ;;  %v1365_v62 = vpop.f32.mrf.mxu0 }
 0x94f   : > { %v1423_v63 = vsel %vm532_vm2, %v1365_v62, -inf }
 0x950   : > { %v2299_v1 = vpop.f32.mrf.mxu0  ;;  %1424 = vmax.xlane.f32.xlu0 %v1423_v63  ;;  %v2294_v2 = vpop.f32.mrf.mxu1 }
 0x952   : > { %v1368_v4 = vpop.f32.mrf.mxu0  ;;  %v1411_v5 = vpop.f32.mrf.mxu1 }
 0x953   : > { %v1426_v6 = vsel %vm532_vm2, %v1411_v5, -inf }
 0x954   : > { %v2300_v7 = vpop.f32.mrf.mxu0  ;;  %1427 = vmax.xlane.f32.xlu1 %v1426_v6  ;;  %v2305_v8 = vpop.f32.mrf.mxu1 }
 0x956   : > { %v1414_v9 = vpop.f32.mrf.mxu1 }
 0x958   : > { %v2306_v10 = vpop.f32.mrf.mxu1 }
 0x963   : > { %v1419_v11 = vpop.xlane.xlu1 %1418 }
 0x964   : > { %v1429_v12 = vsub.f32 %v1273_v53, %v1419_v11 }
 0x965   : > { %1513 = vrot.lane.b32.xlu1 %v1228_v36, %s2730_s15 }
 0x966   : > { %1465 = vrot.lane.b32.xlu0 %v3087_v32, %s2730_s15  ;;  %v1433_v15 = vmul.f32 1.442695, %v1429_v12 }
 0x968   : > { %2495 = vpow2.f32 %v1433_v15 }
 0x975   : > { %v2496_v3 = vpop.eup %2495 }
 0x976   : > { %v1441_v16 = vsel %vm532_vm2, %v2496_v3, 0.0 }
 0x985   : > { %1442 = vadd.xlane.f32.xlu0 %v1441_v16 }
 0x9d5   : > { %v1422_v18 = vpop.xlane.xlu0 %1421 }
 0x9d6   : > { %v1430_v19 = vsub.f32 %v1319_v58, %v1422_v18 }
 0x9d8   : > { %v1435_v20 = vmul.f32 1.442695, %v1430_v19 }
 0x9d9   : > { %v1425_v21 = vpop.xlane.xlu0 %1424 }
 0x9da   : > { %2497 = vpow2.f32 %v1435_v20  ;;  %v1431_v22 = vsub.f32 %v1365_v62, %v1425_v21  ;;  %v2129_v21 = vld [vmem:[%s3261_s9 + $0x6] ss:$0 sm:$0xff] }
 0x9dc   : > { %v1437_v23 = vmul.f32 1.442695, %v1431_v22 }
 0x9dd   : > { %v1466_v17 = vpop.permute.xlu0 %1465  ;;  %v1428_v24 = vpop.xlane.xlu1 %1427 }
 0x9de   : > { %2499 = vpow2.f32 %v1437_v23  ;;  %v1471_v13 = vsel %vm787_vm4, %v1466_v17, 0  ;;  %v1432_v14 = vsub.f32 %v1411_v5, %v1428_v24 }
 0x9df   : > { %2308 = vmatpush3.bf16.msra.mxu0 %v1471_v13 }
 0x9e0   : > { %v1439_v25 = vmul.f32 1.442695, %v1432_v14  ;;  %2319 = vmatprep.subr.bf16.mxu0 %v2726_v0 }
 0x9e1   : > { %v1514_v27 = vpop.permute.xlu1 %1513 }
 0x9e2   : > { %2501 = vpow2.f32 %v1439_v25  ;;  %v1519_v28 = vsel %vm787_vm4, %v1514_v27, 0 }
 0x9e3   : > { %2314 = vmatpush3.bf16.msra.mxu1 %v1519_v28 }
 0x9e4   : > { %2325 = vmatprep.subr.bf16.mxu1 %v2726_v0 }
 0x9e7   : > { %v2498_v29 = vpop.eup %2497 }
 0x9e8   : > { %v1444_v30 = vsel %vm532_vm2, %v2498_v29, 0.0 }
 0x9e9   : > { %1445 = vadd.xlane.f32.xlu1 %v1444_v30 }
 0x9eb   : > { %v2500_v31 = vpop.eup %2499 }
 0x9ec   : > { %v1447_v32 = vsel %vm532_vm2, %v2500_v31, 0.0 }
 0x9ed   : > { %1448 = vadd.xlane.f32.xlu0 %v1447_v32  ;;  %v2472_v32 = vld [vmem:[#allocation10] sm:$0xff]  }
 0x9ef   : > { %v2502_v33 = vpop.eup %2501 }
 0x9f0   : > { %v1450_v34 = vsel %vm532_vm2, %v2502_v33, 0.0 }
 0x9f1   : > { %1451 = vadd.xlane.f32.xlu1 %v1450_v34 }
 0xa02   : > { %1561 = vrot.lane.b32.xlu1 %v3103_v43, %s2730_s15 }
 0xa03   : > { %1609 = vrot.lane.b32.xlu0 %v3114_v48, %s2730_s15 }
 0xa0e   : > { %v1443_v35 = vpop.xlane.xlu0 %1442 }
 0xa0f   : > { %2503 = vrcp.f32 %v1443_v35 }
 0xa1c   : > { %v2504_v36 = vpop.eup %2503 }
 0xa1d   : > { %v1457_v37 = vmul.f32 %v2504_v36, %v2496_v3 }
 0xa1f   : > { %v1461_v38 = vpack.c.bf16 %v1457_v37, %v1457_v37 }
 0xa21   : > { %2310 = vmatmul.mubr.msk.bf16.vlgmr.msra.gmra.mxu0 %vm532_vm2, %v1461_v38  ;;  %v2130_v38 = vld [vmem:[%s3261_s9 + $0x7] ss:$0 sm:$0xff] }
 0xa22   : > { %2321 = vmatprep.mubr.msk.bf16.mxu0 %vm2727_vm0, %v2726_v0 }
 0xa72   : > { %v1446_v39 = vpop.xlane.xlu1 %1445 }
 0xa73   : > { %2505 = vrcp.f32 %v1446_v39 }
 0xa76   : > { %v1449_v40 = vpop.xlane.xlu0 %1448 }
 0xa77   : > { %2507 = vrcp.f32 %v1449_v40  ;;  %v2131_v40 = vld [vmem:[%s3261_s9 + $0x8] ss:$0 sm:$0xff] }
 0xa7a   : > { %v1452_v41 = vpop.xlane.xlu1 %1451  ;;  %v1610_v46 = vpop.permute.xlu0 %1609 }
 0xa7b   : > { %2509 = vrcp.f32 %v1452_v41  ;;  %v1615_v49 = vsel %vm787_vm4, %v1610_v46, 0  ;;  %v2132_v46 = vld [vmem:[%s3261_s9 + $0x9] ss:$0 sm:$0xff] }
 0xa7e   : > { %v1562_v42 = vpop.permute.xlu1 %1561 }
 0xa7f   : > { %v1567_v43 = vsel %vm787_vm4, %v1562_v42, 0 }
 0xa80   : > { %v2506_v44 = vpop.eup %2505  ;;  %2320 = vmatpush3.bf16.msra.mxu0 %v1567_v43 }
 0xa81   : > { %v1458_v45 = vmul.f32 %v2506_v44, %v2498_v29  ;;  %2331 = vmatprep.subr.bf16.mxu0 %v2726_v0  ;;  %v2475_v44 = vld [vmem:[%s3260_s8 + $0x8] sm:$0xff]  }
 0xa83   : > { %v1462_v47 = vpack.c.bf16 %v1458_v45, %v1458_v45  ;;  %v2476_v45 = vld [vmem:[%s3260_s8] sm:$0xff]  }
 0xa84   : > { %v2508_v48 = vpop.eup %2507 }
 0xa85   : > { %2316 = vmatmul.mubr.msk.bf16.vlgmr.msra.gmra.mxu1 %vm532_vm2, %v1462_v47  ;;  %v1459_v50 = vmul.f32 %v2508_v48, %v2500_v31  ;;  %v2471_v31 = vld [vmem:[#allocation10 + $0x8] sm:$0xff]  }
 0xa86   : > { %2326 = vmatpush3.bf16.msra.mxu1 %v1615_v49  ;;  %2327 = vmatprep.mubr.msk.bf16.mxu1 %vm2727_vm0, %v2726_v0 }
 0xa87   : > { %v1463_v51 = vpack.c.bf16 %v1459_v50, %v1459_v50  ;;  %2339 = vmatprep.subr.bf16.mxu1 %v2726_v0 }
 0xa88   : > { %v2510_v52 = vpop.eup %2509 }
 0xa89   : > { %2322 = vmatmul.mubr.msk.bf16.vlgmr.msra.gmra.mxu0 %vm532_vm2, %v1463_v51  ;;  %v1460_v53 = vmul.f32 %v2510_v52, %v2502_v33  ;;  %v2474_v33 = vld [vmem:[%s3260_s8 + $0x10] sm:$0xff]  }
 0xa8a   : > { %2335 = vmatprep.mubr.msk.bf16.mxu0 %vm2727_vm0, %v2726_v0  ;;  %2332 = vmatpush3.bf16.msra.mxu0 %v2469_v59 }
 0xa8b   : > { %v1464_v54 = vpack.c.bf16 %v1460_v53, %v1460_v53  ;;  %2333 = vmatprep.subr.bf16.mxu0 %v2726_v0 }
 0xa8d   : > { %2328 = vmatmul.mubr.msk.bf16.vlgmr.msra.gmra.mxu1 %vm532_vm2, %v1464_v54 }
 0xa8e   : > { %2343 = vmatprep.mubr.msk.bf16.mxu1 %vm2727_vm0, %v2726_v0  ;;  %2334 = vmatpush3.bf16.msra.mxu0 %v2470_v60 }
 0xa8f   : > { %2347 = vmatprep.subr.bf16.mxu0 %v2726_v0  ;;  %2340 = vmatpush3.bf16.msra.mxu1 %v2471_v31 }
 0xa90   : > { %2341 = vmatprep.subr.bf16.mxu1 %v2726_v0 }
 0xa93   : > { %2342 = vmatpush3.bf16.msra.mxu1 %v2472_v32 }
 0xae1   : > { %v1507_v55 = vpop.f32.mrf.mxu0 }
 0xae3   : > { %v2311_v56 = vpop.f32.mrf.mxu0 }
 0xae5   : > { %v1510_v57 = vpop.f32.mrf.mxu0 }
 0xae7   : > { %v2312_v58 = vpop.f32.mrf.mxu0 }
 0xb45   : > { %v1555_v61 = vpop.f32.mrf.mxu1 }
 0xb46   : > { %1658 = vrot.lane.b32.xlu1 %v1555_v61, %s2733_s26  ;;  %s434_s26 = sand.u32 1, %s2709_s14  }
 0xb47   : > { %v2317_v62 = vpop.f32.mrf.mxu1  ;;  %s1941_s15 = scalar_lea.sflag [#allocation4], %s434_s26 }
 0xb49   : > { %v1558_v63 = vpop.f32.mrf.mxu1  ;;  %v1603_v1 = vpop.f32.mrf.mxu0 }
 0xb4a   : > { %1662 = vrot.lane.b32.xlu0 %v1603_v1, %s2734_s30  ;;  %s2089_s30 = sshll.u32 %s434_s26, 3 }
 0xb4b   : > { %v2318_v2 = vpop.f32.mrf.mxu1  ;;  %v2323_v4 = vpop.f32.mrf.mxu0  ;;  %s436_s27 = scalar_lea.vmem [#allocation11], %s2089_s30 }
 0xb4c   : > { %s1954_s21 = sshll.u32 %s436_s27, 4  ;;  %s1955_s21 = int_to_ptr.vmem [resolvable:$true] %s1954_s21 }
 0xb4d   : > { %v1606_v5 = vpop.f32.mrf.mxu0  ;;  %v1651_v6 = vpop.f32.mrf.mxu1  ;;  %s2645_s18 = scalar_lea.vmem %s1955_s21, 128 }
 0xb4e   : > { %1666 = vrot.lane.b32.xlu1 %v1651_v6, %s2735_s29  ;;  %p2646_p4 = scmp.ne.s32.totalorder %s1955_s21, %s2645_s18  ;;  %s2736_s29 = smov [#allocation11]  }
 0xb4f   : > { %v2324_v7 = vpop.f32.mrf.mxu0  ;;  %v2329_v8 = vpop.f32.mrf.mxu1  ;;  %s2649_s28 = sshll.u32 %s2736_s29, 4  ;;  %s2650_s28 = int_to_ptr.vmem [resolvable:$false] %s2649_s28 }
 0xb50   : > { %v2142_v8 = vld [vmem:[%s3261_s9 + $0xb] ss:$0 sm:$0xff]  ;;  %p2647_p9 = pnand %p2646_p4, %p2830_p5  ;;  %s2651_s17 = scalar_lea.vmem %s2650_s28, 256 }
 0xb51   : > { %v1654_v9 = vpop.f32.mrf.mxu1  ;;  %p2652_p7 = scmp.lt.s32.totalorder %s1955_s21, %s2650_s28  ;;  %p2653_p11 = scmp.lt.s32.totalorder %s2651_s17, %s2645_s18 }
 0xb52   : > { %p2648_p8 = pneg %p2647_p9 }
 0xb53   : > { %v2330_v10 = vpop.f32.mrf.mxu1  ;;  %p2654_p13 = por %p2653_p11, %p2652_p7 }
 0xb54   : > { %v2143_v10 = vld [vmem:[%s3261_s9 + $0xc] ss:$0 sm:$0xff] }
 0xb55   : > { %p2655_p0 = pnand %p2654_p13, %p2648_p8 }
 0xbb8   : > { %v1659_v11 = vpop.permute.xlu1 %1658 }
 0xbb9   : > { %v1669_v15 = vsel %vm532_vm2, %v1507_v55, %v1659_v11 }
 0xbbc   : > { %v1663_v12 = vpop.permute.xlu0 %1662 }
 0xbbd   : > { %v1670_v3 = vsel %vm988_vm5, %v1669_v15, %v1663_v12 }
 0xbc0   : > { %v1667_v16 = vpop.permute.xlu1 %1666 }
 0xbc1   : > { %v1671_v18 = vsel %vm990_vm6, %v1670_v3, %v1667_v16 }
 0xbc2   : > { %v1672_v19 = vpack.c.bf16 %v1671_v18, %v1671_v18 }
 0xbc4   : > { %2336 = vmatmul.mubr.msk.bf16.vlgmr.msra.gmra.mxu0 %vm469_vm1, %v1672_v19 }
 0xbc5   : > { %2355 = vmatprep.mubr.msk.bf16.mxu0 %vm2727_vm0, %v2726_v0 }
 0xc84   : > { %v1726_v20 = vpop.f32.mrf.mxu0 }
 0xc85   : > { %v1732_v22 = vadd.f32 %v1726_v20, %v3077_v26  ;;  %v2473_v26 = vld [vmem:[%s3260_s8 + $0x18] sm:$0xff]  }
 0xc86   : > { %v2337_v23 = vpop.f32.mrf.mxu0  ;;  %2348 = vmatpush3.bf16.msra.mxu0 %v2473_v26 }
 0xc87   : > { %v1738_v17 = vadd.f32 %v2129_v21, %v1732_v22  ;;  %2349 = vmatprep.subr.bf16.mxu0 %v2726_v0 }
 0xc88   : > { %v1729_v24 = vpop.f32.mrf.mxu0 }
 0xc89   : > { %v1741_v13 = vsel %vm469_vm1, %v1738_v17, 0.0 }
 0xc8a   : > { %1742 = vadd.xlane.f32.xlu0 %v1741_v13  ;;  %v2338_v14 = vpop.f32.mrf.mxu0  ;;  %2350 = vmatpush3.bf16.msra.mxu0 %v2474_v33 }
 0xc8b   : > { %2351 = vmatprep.subr.bf16.mxu0 %v2726_v0 }
 0xc8e   : > { %2352 = vmatpush3.bf16.msra.mxu0 %v2475_v44 }
 0xc8f   : > { %2353 = vmatprep.subr.bf16.mxu0 %v2726_v0  ;;  %v2141_v0 = vld [vmem:[%s3261_s9 + $0xa] ss:$0 sm:$0xff] }
 0xc92   : > { %2354 = vmatpush3.bf16.msra.mxu0 %v2476_v45 }
 0xd13   : > { %v1743_v25 = vpop.xlane.xlu0 %1742 }
 0xd14   : > { %v1744_v27 = vmul.f32 0.03125, %v1743_v25 }
 0xd16   : > { %v1745_v28 = vsub.f32 %v1738_v17, %v1744_v27 }
 0xd18   : > { %v1746_v29 = vmul.f32 %v1745_v28, %v1745_v28 }
 0xd1a   : > { %v1747_v30 = vsel %vm469_vm1, %v1746_v29, 0.0 }
 0xd1b   : > { %1748 = vadd.xlane.f32.xlu1 %v1747_v30 }
 0xda4   : > { %v1749_v34 = vpop.xlane.xlu1 %1748 }
 0xda5   : > { %v1750_v35 = vmul.f32 0.03125, %v1749_v34 }
 0xda7   : > { %v1751_v36 = vadd.f32 1e-05, %v1750_v35 }
 0xda9   : > { %2511 = vrsqrt.f32 %v1751_v36 }
 0xdb6   : > { %v2512_v37 = vpop.eup %2511 }
 0xdb7   : > { %v1753_v39 = vmul.f32 %v2512_v37, %v1745_v28 }
 0xdb9   : > { %v1758_v41 = vmul.f32 %v2130_v38, %v1753_v39 }
 0xdbb   : > { %v1763_v42 = vadd.f32 %v2131_v40, %v1758_v41 }
 0xdbd   : > { %v1764_v43 = vpack.c.bf16 %v1763_v42, %v1763_v42 }
 0xdbf   : > { %2344 = vmatmul.mubr.msk.bf16.vlgmr.msra.gmra.mxu1 %vm469_vm1, %v1764_v43 }
 0xe7f   : > { %v1823_v47 = vpop.f32.mrf.mxu1 }
 0xe80   : > { %v1824_v48 = vadd.f32 %v2132_v46, %v1823_v47 }
 0xe81   : > { %v2345_v49 = vpop.f32.mrf.mxu1 }
 0xe82   : > { %v1829_v50 = vmax.f32 %v1824_v48, 0.0 }
 0xe83   : > { %v1826_v51 = vpop.f32.mrf.mxu1 }
 0xe84   : > { %v1830_v52 = vpack.c.bf16 %v1829_v50, %v1829_v50 }
 0xe85   : > { %v2346_v53 = vpop.f32.mrf.mxu1 }
 0xe86   : > { %2356 = vmatmul.mubr.msk.bf16.vlgmr.msra.gmra.mxu0 %vm1863_vm7, %v1830_v52 }
 0xf46   : > { %v1901_v54 = vpop.f32.mrf.mxu0 }
 0xf47   : > { %v1907_v55 = vadd.f32 %v1901_v54, %v1763_v42 }
 0xf48   : > { %v2357_v56 = vpop.f32.mrf.mxu0 }
 0xf49   : > { %v1913_v57 = vadd.f32 %v2141_v0, %v1907_v55 }
 0xf4a   : > { %v1904_v58 = vpop.f32.mrf.mxu0 }
 0xf4b   : > { %v1916_v59 = vsel %vm469_vm1, %v1913_v57, 0.0 }
 0xf4c   : > { %1917 = vadd.xlane.f32.xlu0 %v1916_v59  ;;  %v2358_v60 = vpop.f32.mrf.mxu0 }
 0xfd5   : > { %v1918_v61 = vpop.xlane.xlu0 %1917 }
 0xfd6   : > { %v1919_v62 = vmul.f32 0.03125, %v1918_v61 }
 0xfd8   : > { %v1920_v63 = vsub.f32 %v1913_v57, %v1919_v62 }
 0xfda   : > { %v1921_v1 = vmul.f32 %v1920_v63, %v1920_v63 }
 0xfdc   : > { %v1922_v2 = vsel %vm469_vm1, %v1921_v1, 0.0 }
 0xfdd   : > { %1923 = vadd.xlane.f32.xlu0 %v1922_v2 }
0x1066   : > { %v1924_v4 = vpop.xlane.xlu0 %1923 }
0x1067   : > { %v1925_v5 = vmul.f32 0.03125, %v1924_v4 }
0x1069   : > { %v1926_v6 = vadd.f32 1e-05, %v1925_v5 }
0x106b   : > { %2513 = vrsqrt.f32 %v1926_v6 }
0x1078   : > { %v2514_v7 = vpop.eup %2513 }
0x1079   : > { %v1928_v9 = vmul.f32 %v2514_v7, %v1920_v63 }
0x107b   : > { %v1933_v11 = vmul.f32 %v2142_v8, %v1928_v9 }
0x107d   : > { %v1938_v12 = vadd.f32 %v2143_v10, %v1933_v11 }
0x107f   : > { %1939 = vst.msk [vmem:[%s436_s27] sm:$0xff] %vm469_vm1, %v1938_v12 }
0x1080   : > { %2658 = shalt.err (!%p2655_p0)
}
0x1081   : > { %s2659_s30 = scalar_lea.hbm %s1952_s4, 128  ;;  %s2663_s20 = scalar_lea.hbm %s3262_s10, 256 }
0x1082   : > { %p2660_p3 = scmp.ne.s32.totalorder %s1952_s4, %s2659_s30  ;;  %p2664_p12 = scmp.lt.s32.totalorder %s1952_s4, %s3262_s10 }
0x1083   : > { %p2665_p10 = scmp.lt.s32.totalorder %s2663_s20, %s2659_s30 }
0x1084   : > { %p2661_p1 = pnand %p2660_p3, %p2830_p5 }
0x1085   : > { %p2666_p4 = por %p2665_p10, %p2664_p12 }
0x1086   : > { %p2662_p2 = pneg %p2661_p1 }
0x1088   : > { %p2667_p9 = pnand %p2666_p4, %p2662_p2 }
0x108a   : > { %2670 = shalt.err (!%p2667_p9)
}
0x108b   : > { %2379 = dma.vmem_to_hbm [thread:$0]  (%p2830_p5), %s1955_s21, 128, %s1952_s4, %s1941_s15  }
0x108c PF: > { %p2411_p8 = scmp.ge.s32.totalorder %s2717_s16, 2  ;;  %s1966_s25 = sand.u32 1, %s2705_s13  }
0x108d   : > { %s1967_s22 = scalar_lea.sflag [#allocation4], %s1966_s25 }
0x108e   : > { %p2398_p7 = pnand %p2411_p8, %p2834_p6 }
0x1090   : > { %p2399_p11 = pneg %p2398_p7 }
0x1092   : > { %2700 = dma.done.wait (%p2399_p11), %s1967_s22, 128  }
0x1093   : > { %2702 = vsyncadd (%p2399_p11), %s1967_s22, 4294967168  ;;  %s3280_s18 = sld [smem:[#allocation16_spill]]  ;;  %p23_p13 = scmp.ge.s32.totalorder %s2817_s19, 4  }
0x1094   : > { %s3281_s15 = sld [smem:[#allocation17_spill]]  ;;  %s3282_s13 = smov %s2709_s14 }
0x1095   : > { %s3284_s16 = smov %s2817_s19  ;;  %25 = sbr.rel (!%p23_p13) target bundleno = 8 (0x8), region = 119 }
0x1099   : > { %s3283_s14 = smov %s3280_s18 }
0x109a   :  { %1972 = vsyncpa [#allocation3], 1 }
0x109b   :  { %1974 = vsyncpa [#allocation3 + $0x1], 1 }
0x109c   :  { %1975 = vsyncpa [#allocation6], 1 }
0x109d   :  { %1976 = vsyncpa [#allocation9], 1 }
0x109e   :  { %1977 = vsyncpa [#allocation4], 1 }
0x109f   :  { %1979 = vsyncpa [#allocation4 + $0x1], 1 }

</bundles_post_ra>
